<compile_context>
chip_gen: v7x
topology: tpu7x:2x2x1
jax: 0.10.0
libtpu: 0.0.40
codegen_flags: <defaults>
</compile_context>

<pallas_src>
import functools

import jax
import jax.numpy as jnp
from jax.experimental import pallas as pl
from jax.experimental.pallas import tpu as pltpu


# ---------------------------------------------------------------------------
# Pallas kernel: RRI distance-feature construction + 1x1-conv MLP (BN folded)
#                + ReLU + reduction over the neighbor axis ('max' or 'att').
# ---------------------------------------------------------------------------
def _make_rri_kernel(nsample, num_layers, relu_flags, reduction, tn):
    K = nsample
    KM1 = K - 1

    def kernel(*refs):
        knn_ref = refs[0]                               # (1, 3, K, TN)
        layer_refs = refs[1:1 + 2 * num_layers]         # (w0, b0, w1, b1, ...)
        if reduction == "att":
            gw_ref = refs[1 + 2 * num_layers]           # (1, d_last)
            gb_ref = refs[2 + 2 * num_layers]           # (1, 1)
        out_ref = refs[-1]                              # (1, d_last, TN)

        cx = knn_ref[0, 0]                              # (K, TN)
        cy = knn_ref[0, 1]
        cz = knn_ref[0, 2]

        # mean over the K grouped points (includes the query point itself)
        mx = jnp.mean(cx, axis=0, keepdims=True)        # (1, TN)
        my = jnp.mean(cy, axis=0, keepdims=True)
        mz = jnp.mean(cz, axis=0, keepdims=True)

        # the query point itself is neighbor 0 (self is the nearest neighbor)
        px = cx[0:1, :]
        py = cy[0:1, :]
        pz = cz[0:1, :]

        # query-only features (1, TN)
        # TODO(synk): jnp.sqrt of exact zeros is fine forward-only; add an eps
        # if this kernel is ever differentiated.
        r = jnp.sqrt(px * px + py * py + pz * pz)
        rm = jnp.sqrt(mx * mx + my * my + mz * mz)
        d_p_pm = jnp.sqrt((px - mx) ** 2 + (py - my) ** 2 + (pz - mz) ** 2)

        # neighbor features computed as dense (K-1, TN) slabs (vectorized over K)
        ix = cx[1:, :]
        iy = cy[1:, :]
        iz = cz[1:, :]
        ri = jnp.sqrt(ix * ix + iy * iy + iz * iz)
        d_p_pi = jnp.sqrt((px - ix) ** 2 + (py - iy) ** 2 + (pz - iz) ** 2)
        d_pm_pi = jnp.sqrt((ix - mx) ** 2 + (iy - my) ** 2 + (iz - mz) ** 2)

        # fold neighbor axis into lanes: lane index = k * TN + n (128-aligned)
        def flat(x):                                    # (K-1, TN) -> (1, (K-1)*TN)
            return jnp.concatenate([x[k:k + 1, :] for k in range(KM1)], axis=1)

        def tile(x):                                    # (1, TN)   -> (1, (K-1)*TN)
            return jnp.concatenate([x] * KM1, axis=1)

        # single RRI feature slab (6, (K-1)*TN); channel order == torch.stack order
        feat = jnp.concatenate(
            [tile(r), tile(rm), flat(ri), flat(d_p_pi), flat(d_pm_pi), tile(d_p_pm)],
            axis=0)

        # fused 1x1-conv MLP (eval-mode BatchNorm folded): ONE matmul per layer
        # over all neighbors & points of the tile.
        h = feat
        for li in range(num_layers):
            w = layer_refs[2 * li][...]                 # (d_out, d_in)
            b = layer_refs[2 * li + 1][...]             # (d_out, 1)
            h = jnp.dot(w, h, preferred_element_type=jnp.float32) + b
            if relu_flags[li]:
                h = jnp.maximum(h, 0.0)
        # h: (d_last, (K-1)*TN)

        def nbr_block(x, k):                            # static 128-aligned lane slice
            return x[:, k * tn:(k + 1) * tn]

        if reduction == "att":
            g = jnp.dot(gw_ref[...], h,
                        preferred_element_type=jnp.float32) + gb_ref[0, 0]  # (1, (K-1)*TN)
            g_k = [nbr_block(g, k) for k in range(KM1)]                     # (1, TN) each
            gmax = functools.reduce(jnp.maximum, g_k)
            e_k = [jnp.exp(gk - gmax) for gk in g_k]
            denom = functools.reduce(jnp.add, e_k)
            inv = pl.reciprocal(denom, approx=True)     # single EUP reciprocal
            out = nbr_block(h, 0) * (e_k[0] * inv)
            for k in range(1, KM1):
                out = out + nbr_block(h, k) * (e_k[k] * inv)
        else:  # 'max' == max_pool2d over the neighbor axis (all K-1 slices)
            out = nbr_block(h, 0)
            for k in range(1, KM1):
                out = jnp.maximum(out, nbr_block(h, k))

        out_ref[0] = out.astype(out_ref.dtype)

    return kernel


# ---------------------------------------------------------------------------
# Glue: masked kNN grouping (MaskedQueryAndGroup with use_xyz=False).
# ---------------------------------------------------------------------------
def _masked_knn_group(xyz, mask, nsample):
    # TODO(synk): masked top-k neighbor selection has no clean Pallas equivalent;
    # done in plain JAX (lax.top_k + gather). The O(B*N^2) distance matrix is the
    # end-to-end bottleneck for N >= ~4096 and should be tiled there.
    d2 = jnp.sum((xyz[:, :, None, :] - xyz[:, None, :, :]) ** 2, axis=-1)  # (B,N,N)
    d2 = jnp.where(mask[:, None, :] > 0, d2, jnp.float32(1e10))
    _, idx = jax.lax.top_k(-d2, nsample)           # nearest first -> self at slot 0
    knn_xyz = jax.vmap(lambda pts, ii: pts[ii])(xyz, idx)    # (B, N, K, 3)
    # TODO(synk): knn_mask is not applied downstream (matches prior behavior).
    knn_mask = jax.vmap(lambda m, ii: m[ii])(mask, idx)      # (B, N, K)
    return knn_xyz, knn_mask


# ---------------------------------------------------------------------------
# Wrapper: parameter folding + pallas_call.
# ---------------------------------------------------------------------------
def distnet_rri_forward(xyz, mask, params, *, nsample, dims, norm_last,
                        act_last, reduction):
    if reduction not in ("max", "att"):
        raise NotImplementedError(f"Reduction {reduction} not implemented")
    assert nsample >= 2, "need at least one non-self neighbor"

    B, N, _ = xyz.shape
    num_layers = len(dims)
    d_last = dims[-1]
    eps = 1e-5

    knn_xyz, _ = _masked_knn_group(xyz, mask, nsample)
    knn_t = jnp.transpose(knn_xyz, (0, 3, 2, 1)).astype(jnp.float32)  # (B,3,K,N)

    # pad the point axis to lane alignment; padded tail (zeros) is dropped at the end
    N_pad = ((N + 127) // 128) * 128
    if N_pad != N:
        knn_t = jnp.pad(knn_t, ((0, 0), (0, 0), (0, 0), (0, N_pad - N)))

    # lane-dense point tile: prefer 512, shrink to divide N_pad, and ensure >= 2
    # grid steps so both TensorCores are used on v7x whenever possible.
    TN = 512
    while TN > 128 and N_pad % TN != 0:
        TN //= 2
    if B * (N_pad // TN) < 2 and TN >= 256:
        TN //= 2
    grid = (B, N_pad // TN)

    # fold eval-mode BatchNorm2d into the (bias-free) 1x1 conv weights (f32)
    folded = []
    relu_flags = []
    for i in range(num_layers):
        w = params[f"conv{i}_w"].astype(jnp.float32)          # (d_out, d_in)
        has_bn = (i != num_layers - 1) or norm_last
        has_act = (i != num_layers - 1) or act_last
        if has_bn:
            scale = params[f"bn{i}_gamma"] / jnp.sqrt(params[f"bn{i}_var"] + eps)
            w_eff = scale[:, None] * w
            b_eff = (params[f"bn{i}_beta"] - params[f"bn{i}_mean"] * scale)[:, None]
        else:
            w_eff = w
            b_eff = jnp.zeros((w.shape[0], 1), jnp.float32)
        folded.append((w_eff.astype(jnp.float32), b_eff.astype(jnp.float32)))
        relu_flags.append(has_act)

    in_specs = [pl.BlockSpec((1, 3, nsample, TN), lambda b, j: (b, 0, 0, j))]
    inputs = [knn_t]
    for (w_eff, b_eff) in folded:
        in_specs.append(pl.BlockSpec(w_eff.shape, lambda b, j: (0, 0)))
        in_specs.append(pl.BlockSpec(b_eff.shape, lambda b, j: (0, 0)))
        inputs += [w_eff, b_eff]
    if reduction == "att":
        gw = params["gate_w"].astype(jnp.float32)             # (1, d_last)
        gb = params["gate_b"].reshape(1, 1).astype(jnp.float32)
        in_specs.append(pl.BlockSpec(gw.shape, lambda b, j: (0, 0)))
        in_specs.append(pl.BlockSpec(gb.shape, lambda b, j: (0, 0)))
        inputs += [gw, gb]

    kernel = _make_rri_kernel(nsample, num_layers, tuple(relu_flags), reduction, TN)

    out = pl.pallas_call(
        kernel,
        out_shape=jax.ShapeDtypeStruct((B, d_last, N_pad), jnp.float32),
        grid=grid,
        in_specs=in_specs,
        out_specs=pl.BlockSpec((1, d_last, TN), lambda b, j: (b, 0, j)),
        compiler_params=pltpu.CompilerParams(
            dimension_semantics=("parallel", "parallel")),
    )(*inputs)
    return out[:, :, :N]                                       # (B, d_last, N)


# ---------------------------------------------------------------------------
# Pure-JAX reference (mirrors the PyTorch forward) used for validation.
# ---------------------------------------------------------------------------
def distnet_rri_reference(xyz, mask, params, *, nsample, dims, norm_last,
                          act_last, reduction):
    knn_xyz, _ = _masked_knn_group(xyz, mask, nsample)        # (B,N,K,3)
    mean = jnp.mean(knn_xyz, axis=2, keepdims=True)
    allp = jnp.concatenate([mean, knn_xyz], axis=2)           # (B,N,K+1,3)
    r_all = jnp.sqrt(jnp.sum(allp * allp, axis=-1))
    P, Pm, Pi = allp[:, :, 1:2], allp[:, :, 0:1], allp[:, :, 2:]
    d_p_pi = jnp.sqrt(jnp.sum((P - Pi) ** 2, axis=-1))
    d_pm_pi = jnp.sqrt(jnp.sum((Pi - Pm) ** 2, axis=-1))
    d_p_pm = jnp.sqrt(jnp.sum((P - Pm) ** 2, axis=-1))
    r, rm, ri = r_all[:, :, 1:2], r_all[:, :, 0:1], r_all[:, :, 2:]
    shp = ri.shape
    rri = jnp.stack([jnp.broadcast_to(r, shp), jnp.broadcast_to(rm, shp), ri,
                     d_p_pi, d_pm_pi, jnp.broadcast_to(d_p_pm, shp)], axis=-1)
    eps = 1e-5
    num_layers = len(dims)
    h = rri
    for i in range(num_layers):
        h = jnp.einsum("bnkc,dc->bnkd", h, params[f"conv{i}_w"])
        has_bn = (i != num_layers - 1) or norm_last
        has_act = (i != num_layers - 1) or act_last
        if has_bn:
            scale = params[f"bn{i}_gamma"] / jnp.sqrt(params[f"bn{i}_var"] + eps)
            h = h * scale + (params[f"bn{i}_beta"] - params[f"bn{i}_mean"] * scale)
        if has_act:
            h = jnp.maximum(h, 0.0)
    if reduction == "att":
        g = jnp.einsum("bnkc,dc->bnkd", h, params["gate_w"])[..., 0] + params["gate_b"][0]
        a = jax.nn.softmax(g, axis=-1)
        out = jnp.einsum("bnkd,bnk->bnd", h, a)
    else:
        out = jnp.max(h, axis=2)
    return jnp.transpose(out, (0, 2, 1))                      # (B, C, N)


if __name__ == "__main__":
    B, N, nsample = 2, 16, 8
    dims = (32, 64)
    norm_last, act_last = True, True

    key = jax.random.PRNGKey(0)
    keys = jax.random.split(key, 16)
    xyz = jax.random.normal(keys[0], (B, N, 3), jnp.float32)
    mask = jnp.ones((B, N), jnp.float32)

    params = {}
    last_dim = 6  # rri_init_dim
    for i, d in enumerate(dims):
        params[f"conv{i}_w"] = 0.2 * jax.random.normal(keys[1 + 3 * i], (d, last_dim),
                                                       jnp.float32)
        params[f"bn{i}_gamma"] = 1.0 + 0.1 * jax.random.normal(keys[2 + 3 * i], (d,),
                                                               jnp.float32)
        params[f"bn{i}_beta"] = 0.1 * jax.random.normal(keys[3 + 3 * i], (d,),
                                                        jnp.float32)
        params[f"bn{i}_mean"] = 0.05 * jnp.sin(jnp.arange(d, dtype=jnp.float32))
        params[f"bn{i}_var"] = 1.0 + 0.1 * jnp.cos(jnp.arange(d, dtype=jnp.float32)) ** 2
        last_dim = d
    params["gate_w"] = 0.2 * jax.random.normal(keys[10], (1, dims[-1]), jnp.float32)
    params["gate_b"] = 0.1 * jax.random.normal(keys[11], (1,), jnp.float32)

    for reduction in ("att", "max"):
        out = distnet_rri_forward(xyz, mask, params, nsample=nsample, dims=dims,
                                  norm_last=norm_last, act_last=act_last,
                                  reduction=reduction)
        out = jax.block_until_ready(out)
        ref = distnet_rri_reference(xyz, mask, params, nsample=nsample, dims=dims,
                                    norm_last=norm_last, act_last=act_last,
                                    reduction=reduction)
        assert out.shape == (B, dims[-1], N)
        err = float(jnp.max(jnp.abs(out - ref)))
        assert jnp.allclose(out, ref, atol=3e-3, rtol=3e-3), \
            f"{reduction}: max abs err {err}"
    print("KERNEL_OK")
</pallas_src>

<mosaic_0001>
module attributes {stable_mosaic.version = 11 : i64} {
  func.func @kernel(%arg0: i32, %arg1: i32, %arg2: memref<1x3x8x128xf32, #tpu.memory_space<vmem>>, %arg3: memref<32x6xf32, #tpu.memory_space<vmem>>, %arg4: memref<32x1xf32, #tpu.memory_space<vmem>>, %arg5: memref<64x32xf32, #tpu.memory_space<vmem>>, %arg6: memref<64x1xf32, #tpu.memory_space<vmem>>, %arg7: memref<1x64xf32, #tpu.memory_space<vmem>>, %arg8: memref<1x1xf32, #tpu.memory_space<vmem>>, %arg9: memref<1x64x128xf32, #tpu.memory_space<vmem>>) attributes {dimension_semantics = [#tpu.dimension_semantics<parallel>, #tpu.dimension_semantics<parallel>], iteration_bounds = array<i64: 2, 1>, scalar_prefetch = 0 : i64, scratch_operands = 0 : i64, tpu.core_type = #tpu.core_type<tc>, window_params = [{transform_indices = @transform_0, window_bounds = array<i64: 1, 3, 8, 128>}, {pipeline_mode = #tpu.pipeline_mode<synchronous>, transform_indices = @transform_1, window_bounds = array<i64: 32, 6>}, {pipeline_mode = #tpu.pipeline_mode<synchronous>, transform_indices = @transform_2, window_bounds = array<i64: 32, 1>}, {pipeline_mode = #tpu.pipeline_mode<synchronous>, transform_indices = @transform_3, window_bounds = array<i64: 64, 32>}, {pipeline_mode = #tpu.pipeline_mode<synchronous>, transform_indices = @transform_4, window_bounds = array<i64: 64, 1>}, {pipeline_mode = #tpu.pipeline_mode<synchronous>, transform_indices = @transform_5, window_bounds = array<i64: 1, 64>}, {pipeline_mode = #tpu.pipeline_mode<synchronous>, transform_indices = @transform_6, window_bounds = array<i64: 1, 1>}, {transform_indices = @transform_7, window_bounds = array<i64: 1, 64, 128>}]} {
    %c0 = arith.constant 0 : index
    %c0_0 = arith.constant 0 : index
    %c0_1 = arith.constant 0 : index
    %c0_2 = arith.constant 0 : index
    %0 = vector.load %arg2[%c0, %c0_0, %c0_1, %c0_2] : memref<1x3x8x128xf32, #tpu.memory_space<vmem>>, vector<1x1x8x128xf32>
    %1 = vector.shape_cast %0 : vector<1x1x8x128xf32> to vector<8x128xf32>
    %c0_3 = arith.constant 0 : index
    %c1 = arith.constant 1 : index
    %c0_4 = arith.constant 0 : index
    %c0_5 = arith.constant 0 : index
    %2 = vector.load %arg2[%c0_3, %c1, %c0_4, %c0_5] : memref<1x3x8x128xf32, #tpu.memory_space<vmem>>, vector<1x1x8x128xf32>
    %3 = vector.shape_cast %2 : vector<1x1x8x128xf32> to vector<8x128xf32>
    %c0_6 = arith.constant 0 : index
    %c2 = arith.constant 2 : index
    %c0_7 = arith.constant 0 : index
    %c0_8 = arith.constant 0 : index
    %4 = vector.load %arg2[%c0_6, %c2, %c0_7, %c0_8] : memref<1x3x8x128xf32, #tpu.memory_space<vmem>>, vector<1x1x8x128xf32>
    %5 = vector.shape_cast %4 : vector<1x1x8x128xf32> to vector<8x128xf32>
    %cst = arith.constant dense<0.000000e+00> : vector<128xf32>
    %6 = vector.multi_reduction <add>, %1, %cst [0] : vector<8x128xf32> to vector<128xf32>
    %7 = vector.shape_cast %6 : vector<128xf32> to vector<1x128xf32>
    %cst_9 = arith.constant 8.000000e+00 : f32
    %8 = vector.broadcast %cst_9 : f32 to vector<1x128xf32>
    %9 = arith.divf %7, %8 : vector<1x128xf32>
    %cst_10 = arith.constant dense<0.000000e+00> : vector<128xf32>
    %10 = vector.multi_reduction <add>, %3, %cst_10 [0] : vector<8x128xf32> to vector<128xf32>
    %11 = vector.shape_cast %10 : vector<128xf32> to vector<1x128xf32>
    %cst_11 = arith.constant 8.000000e+00 : f32
    %12 = vector.broadcast %cst_11 : f32 to vector<1x128xf32>
    %13 = arith.divf %11, %12 : vector<1x128xf32>
    %cst_12 = arith.constant dense<0.000000e+00> : vector<128xf32>
    %14 = vector.multi_reduction <add>, %5, %cst_12 [0] : vector<8x128xf32> to vector<128xf32>
    %15 = vector.shape_cast %14 : vector<128xf32> to vector<1x128xf32>
    %cst_13 = arith.constant 8.000000e+00 : f32
    %16 = vector.broadcast %cst_13 : f32 to vector<1x128xf32>
    %17 = arith.divf %15, %16 : vector<1x128xf32>
    %18 = vector.extract_strided_slice %1 {offsets = [0, 0], sizes = [1, 128], strides = [1, 1]} : vector<8x128xf32> to vector<1x128xf32>
    %19 = vector.extract_strided_slice %3 {offsets = [0, 0], sizes = [1, 128], strides = [1, 1]} : vector<8x128xf32> to vector<1x128xf32>
    %20 = vector.extract_strided_slice %5 {offsets = [0, 0], sizes = [1, 128], strides = [1, 1]} : vector<8x128xf32> to vector<1x128xf32>
    %21 = arith.mulf %18, %18 : vector<1x128xf32>
    %22 = arith.mulf %19, %19 : vector<1x128xf32>
    %23 = arith.addf %21, %22 : vector<1x128xf32>
    %24 = arith.mulf %20, %20 : vector<1x128xf32>
    %25 = arith.addf %23, %24 : vector<1x128xf32>
    %26 = math.sqrt %25 : vector<1x128xf32>
    %27 = arith.mulf %9, %9 : vector<1x128xf32>
    %28 = arith.mulf %13, %13 : vector<1x128xf32>
    %29 = arith.addf %27, %28 : vector<1x128xf32>
    %30 = arith.mulf %17, %17 : vector<1x128xf32>
    %31 = arith.addf %29, %30 : vector<1x128xf32>
    %32 = math.sqrt %31 : vector<1x128xf32>
    %33 = arith.subf %18, %9 : vector<1x128xf32>
    %34 = arith.mulf %33, %33 : vector<1x128xf32>
    %35 = arith.subf %19, %13 : vector<1x128xf32>
    %36 = arith.mulf %35, %35 : vector<1x128xf32>
    %37 = arith.addf %34, %36 : vector<1x128xf32>
    %38 = arith.subf %20, %17 : vector<1x128xf32>
    %39 = arith.mulf %38, %38 : vector<1x128xf32>
    %40 = arith.addf %37, %39 : vector<1x128xf32>
    %41 = math.sqrt %40 : vector<1x128xf32>
    %42 = vector.extract_strided_slice %1 {offsets = [1, 0], sizes = [7, 128], strides = [1, 1]} : vector<8x128xf32> to vector<7x128xf32>
    %43 = vector.extract_strided_slice %3 {offsets = [1, 0], sizes = [7, 128], strides = [1, 1]} : vector<8x128xf32> to vector<7x128xf32>
    %44 = vector.extract_strided_slice %5 {offsets = [1, 0], sizes = [7, 128], strides = [1, 1]} : vector<8x128xf32> to vector<7x128xf32>
    %45 = arith.mulf %42, %42 : vector<7x128xf32>
    %46 = arith.mulf %43, %43 : vector<7x128xf32>
    %47 = arith.addf %45, %46 : vector<7x128xf32>
    %48 = arith.mulf %44, %44 : vector<7x128xf32>
    %49 = arith.addf %47, %48 : vector<7x128xf32>
    %50 = math.sqrt %49 : vector<7x128xf32>
    %51 = vector.broadcast %18 : vector<1x128xf32> to vector<7x128xf32>
    %52 = arith.subf %51, %42 : vector<7x128xf32>
    %53 = arith.mulf %52, %52 : vector<7x128xf32>
    %54 = vector.broadcast %19 : vector<1x128xf32> to vector<7x128xf32>
    %55 = arith.subf %54, %43 : vector<7x128xf32>
    %56 = arith.mulf %55, %55 : vector<7x128xf32>
    %57 = arith.addf %53, %56 : vector<7x128xf32>
    %58 = vector.broadcast %20 : vector<1x128xf32> to vector<7x128xf32>
    %59 = arith.subf %58, %44 : vector<7x128xf32>
    %60 = arith.mulf %59, %59 : vector<7x128xf32>
    %61 = arith.addf %57, %60 : vector<7x128xf32>
    %62 = math.sqrt %61 : vector<7x128xf32>
    %63 = vector.broadcast %9 : vector<1x128xf32> to vector<7x128xf32>
    %64 = arith.subf %42, %63 : vector<7x128xf32>
    %65 = arith.mulf %64, %64 : vector<7x128xf32>
    %66 = vector.broadcast %13 : vector<1x128xf32> to vector<7x128xf32>
    %67 = arith.subf %43, %66 : vector<7x128xf32>
    %68 = arith.mulf %67, %67 : vector<7x128xf32>
    %69 = arith.addf %65, %68 : vector<7x128xf32>
    %70 = vector.broadcast %17 : vector<1x128xf32> to vector<7x128xf32>
    %71 = arith.subf %44, %70 : vector<7x128xf32>
    %72 = arith.mulf %71, %71 : vector<7x128xf32>
    %73 = arith.addf %69, %72 : vector<7x128xf32>
    %74 = math.sqrt %73 : vector<7x128xf32>
    %75 = tpu.concatenate %26, %26, %26, %26, %26, %26, %26 in 1 : vector<1x128xf32>, vector<1x128xf32>, vector<1x128xf32>, vector<1x128xf32>, vector<1x128xf32>, vector<1x128xf32>, vector<1x128xf32> -> vector<1x896xf32>
    %76 = tpu.concatenate %32, %32, %32, %32, %32, %32, %32 in 1 : vector<1x128xf32>, vector<1x128xf32>, vector<1x128xf32>, vector<1x128xf32>, vector<1x128xf32>, vector<1x128xf32>, vector<1x128xf32> -> vector<1x896xf32>
    %77 = vector.extract_strided_slice %50 {offsets = [0, 0], sizes = [1, 128], strides = [1, 1]} : vector<7x128xf32> to vector<1x128xf32>
    %78 = vector.extract_strided_slice %50 {offsets = [1, 0], sizes = [1, 128], strides = [1, 1]} : vector<7x128xf32> to vector<1x128xf32>
    %79 = vector.extract_strided_slice %50 {offsets = [2, 0], sizes = [1, 128], strides = [1, 1]} : vector<7x128xf32> to vector<1x128xf32>
    %80 = vector.extract_strided_slice %50 {offsets = [3, 0], sizes = [1, 128], strides = [1, 1]} : vector<7x128xf32> to vector<1x128xf32>
    %81 = vector.extract_strided_slice %50 {offsets = [4, 0], sizes = [1, 128], strides = [1, 1]} : vector<7x128xf32> to vector<1x128xf32>
    %82 = vector.extract_strided_slice %50 {offsets = [5, 0], sizes = [1, 128], strides = [1, 1]} : vector<7x128xf32> to vector<1x128xf32>
    %83 = vector.extract_strided_slice %50 {offsets = [6, 0], sizes = [1, 128], strides = [1, 1]} : vector<7x128xf32> to vector<1x128xf32>
    %84 = tpu.concatenate %77, %78, %79, %80, %81, %82, %83 in 1 : vector<1x128xf32>, vector<1x128xf32>, vector<1x128xf32>, vector<1x128xf32>, vector<1x128xf32>, vector<1x128xf32>, vector<1x128xf32> -> vector<1x896xf32>
    %85 = vector.extract_strided_slice %62 {offsets = [0, 0], sizes = [1, 128], strides = [1, 1]} : vector<7x128xf32> to vector<1x128xf32>
    %86 = vector.extract_strided_slice %62 {offsets = [1, 0], sizes = [1, 128], strides = [1, 1]} : vector<7x128xf32> to vector<1x128xf32>
    %87 = vector.extract_strided_slice %62 {offsets = [2, 0], sizes = [1, 128], strides = [1, 1]} : vector<7x128xf32> to vector<1x128xf32>
    %88 = vector.extract_strided_slice %62 {offsets = [3, 0], sizes = [1, 128], strides = [1, 1]} : vector<7x128xf32> to vector<1x128xf32>
    %89 = vector.extract_strided_slice %62 {offsets = [4, 0], sizes = [1, 128], strides = [1, 1]} : vector<7x128xf32> to vector<1x128xf32>
    %90 = vector.extract_strided_slice %62 {offsets = [5, 0], sizes = [1, 128], strides = [1, 1]} : vector<7x128xf32> to vector<1x128xf32>
    %91 = vector.extract_strided_slice %62 {offsets = [6, 0], sizes = [1, 128], strides = [1, 1]} : vector<7x128xf32> to vector<1x128xf32>
    %92 = tpu.concatenate %85, %86, %87, %88, %89, %90, %91 in 1 : vector<1x128xf32>, vector<1x128xf32>, vector<1x128xf32>, vector<1x128xf32>, vector<1x128xf32>, vector<1x128xf32>, vector<1x128xf32> -> vector<1x896xf32>
    %93 = vector.extract_strided_slice %74 {offsets = [0, 0], sizes = [1, 128], strides = [1, 1]} : vector<7x128xf32> to vector<1x128xf32>
    %94 = vector.extract_strided_slice %74 {offsets = [1, 0], sizes = [1, 128], strides = [1, 1]} : vector<7x128xf32> to vector<1x128xf32>
    %95 = vector.extract_strided_slice %74 {offsets = [2, 0], sizes = [1, 128], strides = [1, 1]} : vector<7x128xf32> to vector<1x128xf32>
    %96 = vector.extract_strided_slice %74 {offsets = [3, 0], sizes = [1, 128], strides = [1, 1]} : vector<7x128xf32> to vector<1x128xf32>
    %97 = vector.extract_strided_slice %74 {offsets = [4, 0], sizes = [1, 128], strides = [1, 1]} : vector<7x128xf32> to vector<1x128xf32>
    %98 = vector.extract_strided_slice %74 {offsets = [5, 0], sizes = [1, 128], strides = [1, 1]} : vector<7x128xf32> to vector<1x128xf32>
    %99 = vector.extract_strided_slice %74 {offsets = [6, 0], sizes = [1, 128], strides = [1, 1]} : vector<7x128xf32> to vector<1x128xf32>
    %100 = tpu.concatenate %93, %94, %95, %96, %97, %98, %99 in 1 : vector<1x128xf32>, vector<1x128xf32>, vector<1x128xf32>, vector<1x128xf32>, vector<1x128xf32>, vector<1x128xf32>, vector<1x128xf32> -> vector<1x896xf32>
    %101 = tpu.concatenate %41, %41, %41, %41, %41, %41, %41 in 1 : vector<1x128xf32>, vector<1x128xf32>, vector<1x128xf32>, vector<1x128xf32>, vector<1x128xf32>, vector<1x128xf32>, vector<1x128xf32> -> vector<1x896xf32>
    %102 = tpu.concatenate %75, %76, %84, %92, %100, %101 in 0 : vector<1x896xf32>, vector<1x896xf32>, vector<1x896xf32>, vector<1x896xf32>, vector<1x896xf32>, vector<1x896xf32> -> vector<6x896xf32>
    %c0_14 = arith.constant 0 : index
    %c0_15 = arith.constant 0 : index
    %103 = vector.load %arg3[%c0_14, %c0_15] : memref<32x6xf32, #tpu.memory_space<vmem>>, vector<32x6xf32>
    %c0_16 = arith.constant 0 : index
    %c0_17 = arith.constant 0 : index
    %104 = vector.load %arg4[%c0_16, %c0_17] : memref<32x1xf32, #tpu.memory_space<vmem>>, vector<32x1xf32>
    %cst_18 = arith.constant dense<0.000000e+00> : vector<32x896xf32>
    %105 = tpu.matmul %103, %102, %cst_18 {dimension_numbers = #tpu.dot_dimension_numbers<[1], [0], [0], [1], [0, 0, 1, 1], [], []>} : vector<32x6xf32>, vector<6x896xf32>, vector<32x896xf32> -> vector<32x896xf32>
    %106 = vector.broadcast %104 : vector<32x1xf32> to vector<32x896xf32>
    %107 = arith.addf %105, %106 : vector<32x896xf32>
    %cst_19 = arith.constant 0.000000e+00 : f32
    %108 = vector.broadcast %cst_19 : f32 to vector<32x896xf32>
    %109 = arith.maximumf %107, %108 : vector<32x896xf32>
    %c0_20 = arith.constant 0 : index
    %c0_21 = arith.constant 0 : index
    %110 = vector.load %arg5[%c0_20, %c0_21] : memref<64x32xf32, #tpu.memory_space<vmem>>, vector<64x32xf32>
    %c0_22 = arith.constant 0 : index
    %c0_23 = arith.constant 0 : index
    %111 = vector.load %arg6[%c0_22, %c0_23] : memref<64x1xf32, #tpu.memory_space<vmem>>, vector<64x1xf32>
    %cst_24 = arith.constant dense<0.000000e+00> : vector<64x896xf32>
    %112 = tpu.matmul %110, %109, %cst_24 {dimension_numbers = #tpu.dot_dimension_numbers<[1], [0], [0], [1], [0, 0, 1, 1], [], []>} : vector<64x32xf32>, vector<32x896xf32>, vector<64x896xf32> -> vector<64x896xf32>
    %113 = vector.broadcast %111 : vector<64x1xf32> to vector<64x896xf32>
    %114 = arith.addf %112, %113 : vector<64x896xf32>
    %cst_25 = arith.constant 0.000000e+00 : f32
    %115 = vector.broadcast %cst_25 : f32 to vector<64x896xf32>
    %116 = arith.maximumf %114, %115 : vector<64x896xf32>
    %c0_26 = arith.constant 0 : index
    %c0_27 = arith.constant 0 : index
    %117 = vector.load %arg7[%c0_26, %c0_27] : memref<1x64xf32, #tpu.memory_space<vmem>>, vector<1x64xf32>
    %cst_28 = arith.constant dense<0.000000e+00> : vector<1x896xf32>
    %118 = tpu.matmul %117, %116, %cst_28 {dimension_numbers = #tpu.dot_dimension_numbers<[1], [0], [0], [1], [0, 0, 1, 1], [], []>} : vector<1x64xf32>, vector<64x896xf32>, vector<1x896xf32> -> vector<1x896xf32>
    %c0_29 = arith.constant 0 : index
    %c0_30 = arith.constant 0 : index
    %119 = vector.load %arg8[%c0_29, %c0_30] : memref<1x1xf32, #tpu.memory_space<vmem>>, vector<1x1xf32>
    %120 = vector.extract %119[0, 0] : f32 from vector<1x1xf32>
    %121 = vector.broadcast %120 : f32 to vector<1x896xf32>
    %122 = arith.addf %118, %121 : vector<1x896xf32>
    %123 = vector.extract_strided_slice %122 {offsets = [0, 0], sizes = [1, 128], strides = [1, 1]} : vector<1x896xf32> to vector<1x128xf32>
    %124 = vector.extract_strided_slice %122 {offsets = [0, 128], sizes = [1, 128], strides = [1, 1]} : vector<1x896xf32> to vector<1x128xf32>
    %125 = vector.extract_strided_slice %122 {offsets = [0, 256], sizes = [1, 128], strides = [1, 1]} : vector<1x896xf32> to vector<1x128xf32>
    %126 = vector.extract_strided_slice %122 {offsets = [0, 384], sizes = [1, 128], strides = [1, 1]} : vector<1x896xf32> to vector<1x128xf32>
    %127 = vector.extract_strided_slice %122 {offsets = [0, 512], sizes = [1, 128], strides = [1, 1]} : vector<1x896xf32> to vector<1x128xf32>
    %128 = vector.extract_strided_slice %122 {offsets = [0, 640], sizes = [1, 128], strides = [1, 1]} : vector<1x896xf32> to vector<1x128xf32>
    %129 = vector.extract_strided_slice %122 {offsets = [0, 768], sizes = [1, 128], strides = [1, 1]} : vector<1x896xf32> to vector<1x128xf32>
    %130 = arith.maximumf %123, %124 : vector<1x128xf32>
    %131 = arith.maximumf %130, %125 : vector<1x128xf32>
    %132 = arith.maximumf %131, %126 : vector<1x128xf32>
    %133 = arith.maximumf %132, %127 : vector<1x128xf32>
    %134 = arith.maximumf %133, %128 : vector<1x128xf32>
    %135 = arith.maximumf %134, %129 : vector<1x128xf32>
    %136 = arith.subf %123, %135 : vector<1x128xf32>
    %137 = math.exp %136 : vector<1x128xf32>
    %138 = arith.subf %124, %135 : vector<1x128xf32>
    %139 = math.exp %138 : vector<1x128xf32>
    %140 = arith.subf %125, %135 : vector<1x128xf32>
    %141 = math.exp %140 : vector<1x128xf32>
    %142 = arith.subf %126, %135 : vector<1x128xf32>
    %143 = math.exp %142 : vector<1x128xf32>
    %144 = arith.subf %127, %135 : vector<1x128xf32>
    %145 = math.exp %144 : vector<1x128xf32>
    %146 = arith.subf %128, %135 : vector<1x128xf32>
    %147 = math.exp %146 : vector<1x128xf32>
    %148 = arith.subf %129, %135 : vector<1x128xf32>
    %149 = math.exp %148 : vector<1x128xf32>
    %150 = arith.addf %137, %139 : vector<1x128xf32>
    %151 = arith.addf %150, %141 : vector<1x128xf32>
    %152 = arith.addf %151, %143 : vector<1x128xf32>
    %153 = arith.addf %152, %145 : vector<1x128xf32>
    %154 = arith.addf %153, %147 : vector<1x128xf32>
    %155 = arith.addf %154, %149 : vector<1x128xf32>
    %156 = tpu.reciprocal %155 {approx = true} : vector<1x128xf32> -> vector<1x128xf32>
    %157 = vector.extract_strided_slice %116 {offsets = [0, 0], sizes = [64, 128], strides = [1, 1]} : vector<64x896xf32> to vector<64x128xf32>
    %158 = arith.mulf %137, %156 : vector<1x128xf32>
    %159 = vector.broadcast %158 : vector<1x128xf32> to vector<64x128xf32>
    %160 = arith.mulf %157, %159 : vector<64x128xf32>
    %161 = vector.extract_strided_slice %116 {offsets = [0, 128], sizes = [64, 128], strides = [1, 1]} : vector<64x896xf32> to vector<64x128xf32>
    %162 = arith.mulf %139, %156 : vector<1x128xf32>
    %163 = vector.broadcast %162 : vector<1x128xf32> to vector<64x128xf32>
    %164 = arith.mulf %161, %163 : vector<64x128xf32>
    %165 = arith.addf %160, %164 : vector<64x128xf32>
    %166 = vector.extract_strided_slice %116 {offsets = [0, 256], sizes = [64, 128], strides = [1, 1]} : vector<64x896xf32> to vector<64x128xf32>
    %167 = arith.mulf %141, %156 : vector<1x128xf32>
    %168 = vector.broadcast %167 : vector<1x128xf32> to vector<64x128xf32>
    %169 = arith.mulf %166, %168 : vector<64x128xf32>
    %170 = arith.addf %165, %169 : vector<64x128xf32>
    %171 = vector.extract_strided_slice %116 {offsets = [0, 384], sizes = [64, 128], strides = [1, 1]} : vector<64x896xf32> to vector<64x128xf32>
    %172 = arith.mulf %143, %156 : vector<1x128xf32>
    %173 = vector.broadcast %172 : vector<1x128xf32> to vector<64x128xf32>
    %174 = arith.mulf %171, %173 : vector<64x128xf32>
    %175 = arith.addf %170, %174 : vector<64x128xf32>
    %176 = vector.extract_strided_slice %116 {offsets = [0, 512], sizes = [64, 128], strides = [1, 1]} : vector<64x896xf32> to vector<64x128xf32>
    %177 = arith.mulf %145, %156 : vector<1x128xf32>
    %178 = vector.broadcast %177 : vector<1x128xf32> to vector<64x128xf32>
    %179 = arith.mulf %176, %178 : vector<64x128xf32>
    %180 = arith.addf %175, %179 : vector<64x128xf32>
    %181 = vector.extract_strided_slice %116 {offsets = [0, 640], sizes = [64, 128], strides = [1, 1]} : vector<64x896xf32> to vector<64x128xf32>
    %182 = arith.mulf %147, %156 : vector<1x128xf32>
    %183 = vector.broadcast %182 : vector<1x128xf32> to vector<64x128xf32>
    %184 = arith.mulf %181, %183 : vector<64x128xf32>
    %185 = arith.addf %180, %184 : vector<64x128xf32>
    %186 = vector.extract_strided_slice %116 {offsets = [0, 768], sizes = [64, 128], strides = [1, 1]} : vector<64x896xf32> to vector<64x128xf32>
    %187 = arith.mulf %149, %156 : vector<1x128xf32>
    %188 = vector.broadcast %187 : vector<1x128xf32> to vector<64x128xf32>
    %189 = arith.mulf %186, %188 : vector<64x128xf32>
    %190 = arith.addf %185, %189 : vector<64x128xf32>
    %c0_31 = arith.constant 0 : index
    %c0_32 = arith.constant 0 : index
    %c0_33 = arith.constant 0 : index
    %191 = vector.load %arg9[%c0_31, %c0_32, %c0_33] : memref<1x64x128xf32, #tpu.memory_space<vmem>>, vector<1x64x128xf32>
    %192 = vector.shape_cast %191 : vector<1x64x128xf32> to vector<64x128xf32>
    %193 = vector.shape_cast %190 : vector<64x128xf32> to vector<1x64x128xf32>
    tpu.vector_store %arg9[%c0_31, %c0_32, %c0_33], %193 {strides = array<i32>} : memref<1x64x128xf32, #tpu.memory_space<vmem>>, vector<1x64x128xf32>,
    return
  }
  func.func @transform_0(%arg0: i32, %arg1: i32) -> (i32, i32, i32, i32) {
    %c0_i32 = arith.constant 0 : i32
    %c0_i32_0 = arith.constant 0 : i32
    %c0_i32_1 = arith.constant 0 : i32
    return %arg0, %c0_i32, %c0_i32_0, %arg1 : i32, i32, i32, i32
  }
  func.func @transform_1(%arg0: i32, %arg1: i32) -> (i32, i32) {
    %c0_i32 = arith.constant 0 : i32
    %c0_i32_0 = arith.constant 0 : i32
    %c0_i32_1 = arith.constant 0 : i32
    return %c0_i32, %c0_i32_0 : i32, i32
  }
  func.func @transform_2(%arg0: i32, %arg1: i32) -> (i32, i32) {
    %c0_i32 = arith.constant 0 : i32
    %c0_i32_0 = arith.constant 0 : i32
    %c0_i32_1 = arith.constant 0 : i32
    return %c0_i32, %c0_i32_0 : i32, i32
  }
  func.func @transform_3(%arg0: i32, %arg1: i32) -> (i32, i32) {
    %c0_i32 = arith.constant 0 : i32
    %c0_i32_0 = arith.constant 0 : i32
    %c0_i32_1 = arith.constant 0 : i32
    return %c0_i32, %c0_i32_0 : i32, i32
  }
  func.func @transform_4(%arg0: i32, %arg1: i32) -> (i32, i32) {
    %c0_i32 = arith.constant 0 : i32
    %c0_i32_0 = arith.constant 0 : i32
    %c0_i32_1 = arith.constant 0 : i32
    return %c0_i32, %c0_i32_0 : i32, i32
  }
  func.func @transform_5(%arg0: i32, %arg1: i32) -> (i32, i32) {
    %c0_i32 = arith.constant 0 : i32
    %c0_i32_0 = arith.constant 0 : i32
    %c0_i32_1 = arith.constant 0 : i32
    return %c0_i32, %c0_i32_0 : i32, i32
  }
  func.func @transform_6(%arg0: i32, %arg1: i32) -> (i32, i32) {
    %c0_i32 = arith.constant 0 : i32
    %c0_i32_0 = arith.constant 0 : i32
    %c0_i32_1 = arith.constant 0 : i32
    return %c0_i32, %c0_i32_0 : i32, i32
  }
  func.func @transform_7(%arg0: i32, %arg1: i32) -> (i32, i32, i32) {
    %c0_i32 = arith.constant 0 : i32
    %c0_i32_0 = arith.constant 0 : i32
    return %arg0, %c0_i32, %arg1 : i32, i32, i32
  }
}

</mosaic_0001>

<bundles_post_ra>
// kernel: tpu_custom_call.1
= control target key start
LH: loop header
LB: loop body
LE: loop exit
PB: predicated region body
PF: predicated region fallthrough
CT: control target
= control target key end

     0   :  { %s3485_s0 = inlined_call_operand.vmem [shape: f32[2,3,8,128], index: 0, kind: input, shape index: {}]   ;;  %s3486_s1 = inlined_call_operand.vmem [shape: f32[32,6], index: 1, kind: input, shape index: {}]   ;;  %s3487_s2 = inlined_call_operand.vmem [shape: f32[32,1], index: 2, kind: input, shape index: {}]   ;;  %s3488_s3 = inlined_call_operand.vmem [shape: f32[64,32], index: 3, kind: input, shape index: {}]   ;;  %s3489_s4 = inlined_call_operand.vmem [shape: f32[64,1], index: 4, kind: input, shape index: {}]   ;;  %s3490_s5 = inlined_call_operand.vmem [shape: f32[1,64], index: 5, kind: input, shape index: {}]   ;;  %s3491_s6 = inlined_call_operand.<no memory space> [shape: f32[1,1], index: 6, kind: input, shape index: {}]   ;;  %s3492_s7 = inlined_call_operand.hbm [shape: f32[2,64,128], index: 7, kind: output, shape index: {}]  }
   0x1   :  { %v12_v0 = vstv %s3491_s6 }
   0x2   :  { %13 = vst [vmem:[#allocation2] sm:$0x1] %v12_v0 }
   0x3   :  { %14 = vsyncpa [#allocation4], 0 }
   0x4   :  { %16 = vsyncpa [#allocation4 + $0x1], 0  ;;  %s2561_s26 = smov 0   ;;  %s2563_s27 = smov 0  }
   0x5   :  { %s2565_s28 = smov 0   ;;  %s2567_s29 = smov 0  }
   0x6   :  { %s2569_s30 = smov 0   ;;  %s2571_s8 = smov 0  }
   0x7 LB: > { %s2085_s6 = sadd.s32 4294967295, %s2509_s8   ;;  %s2086_s9 = sadd.s32 4294967294, %s2509_s8   ;;  %s2509_s8 = sphi %s2571_s8, %s22_s8   ;;  %s2505_s30 = sphi %s2569_s30, %s3670_s30   ;;  %s2501_s29 = sphi %s2567_s29, %s3669_s29   ;;  %s2497_s28 = sphi %s2565_s28, %s3668_s28   ;;  %s2493_s27 = sphi %s2563_s27, %s3667_s27   ;;  %s2489_s26 = sphi %s2561_s26, %s3666_s26  }
   0x8   : > { %s34_s10 = sadd.s32 1, %s2505_s30  ;;  %s197_s11 = sadd.s32 1, %s2497_s28 }
   0x9   : > { %p36_p0 = scmp.ge.s32.totalorder %s34_s10, 2  ;;  %p207_p1 = scmp.ne.s32.totalorder %s2497_s28, %s2493_s27 }
   0xa   : > { %p208_p2 = scmp.eq.s32.totalorder %s2085_s6, 1  ;;  %p213_p3 = scmp.ne.s32.totalorder %s2493_s27, %s2489_s26 }
   0xb   : > { %s3672_s10 = smov (%p36_p0, %s34_s10), 0  ;;  %p214_p5 = scmp.eq.s32.totalorder %s2086_s9, 1 }
   0xc   : > { %p2601_p4 = por %p208_p2, %p207_p1  ;;  %s192_s13 = ssub.s32 %s2505_s30, %s3672_s10 }
   0xd   : > { %p2089_p6 = scmp.ge.s32.totalorder %s2509_s8, 1  ;;  %p195_p7 = scmp.eq.s32.totalorder %s192_s13, 0 }
   0xe   : > { %p2608_p8 = por %p214_p5, %p213_p3  ;;  %p261_p9 = scmp.lt.s32.totalorder %s2509_s8, 3 }
   0xf   : > { %s2614_s15 = scalar_select %p195_p7, %s2497_s28, %s197_s11  }
  0x10   : > { %p262_p10 = pnand %p2089_p6, %p261_p9 }
  0x12   : > { %265 = sbr.rel (%p262_p10) target bundleno = 911 (0x38f), region = 48 }
  0x19   : > { %p296_p11 = scmp.lt.s32.totalorder %s2501_s29, 1  ;;  %v370_v1 = vlaneseq  ;;  %v3529_v3 = vmov 0.0   ;;  %v500_v4 = vld [vmem:[%s3487_s2] sm:$0xff]  ;;  %v502_v5 = vld [vmem:[%s3487_s2 + $0x10] sm:$0xff]  ;;  %v2512_v6 = vmov 0   ;;  %v501_v8 = vld [vmem:[%s3487_s2 + $0x8] sm:$0xff] }
  0x1a   : > { %623 = vmatprep.mubr.f32.mxu0 %v3529_v3  ;;  %718 = vmatprep.mubr.f32.mxu1 %v3529_v3  ;;  %v503_v9 = vld [vmem:[%s3487_s2 + $0x18] sm:$0xff]  ;;  %v947_v21 = vld [vmem:[%s3489_s4] sm:$0xff]  ;;  %v948_v22 = vld [vmem:[%s3489_s4 + $0x8] sm:$0xff]  ;;  %vm462_vm5 = vcmask 1040384   ;;  %vm464_vm7 = vcmask 1041408   ;;  %vm472_vm8 = vcmask 1042432  }
  0x1b   : > { %s297_s16 = scalar_select %p296_p11, %s2501_s29, 1  ;;  %v371_v2 = vshrl.u32 %v370_v1, 7  ;;  %2405 = vset.pattern.permute.xlu0 %v2512_v6  ;;  %2406 = vset.pattern.permute.xlu1 %v2512_v6  ;;  %v949_v37 = vld [vmem:[%s3489_s4 + $0x10] sm:$0xff]  ;;  %v950_v38 = vld [vmem:[%s3489_s4 + $0x18] sm:$0xff]  ;;  %v951_v47 = vld [vmem:[%s3489_s4 + $0x20] sm:$0xff]  ;;  %vm480_vm9 = vcmask 1043456  }
  0x1c   : > { %506 = vperm.xlu0 %2405, %v500_v4   ;;  %516 = vperm.xlu1 %2406, %v502_v5   ;;  %v952_v48 = vld [vmem:[%s3489_s4 + $0x28] sm:$0xff]  ;;  %v953_v56 = vld [vmem:[%s3489_s4 + $0x30] sm:$0xff]  ;;  %v954_v57 = vld [vmem:[%s3489_s4 + $0x38] sm:$0xff]  ;;  %vm488_vm10 = vcmask 1044480   ;;  %vm537_vm11 = vcmask 1045504   ;;  %vm524_vm13 = vcmask 48128  }
  0x1d   : > { %s2341_s21 = smul.u32 24, %s297_s16  ;;  %v2626_v7 = vsub.s32 0, %v371_v2  ;;  %vm995_vm15 = vcmask 261120   ;;  %s293_s16 = sand.u32 1, %s2493_s27  }
  0x1e   : > { %s3366_s17 = sshll.u32 %s293_s16, 6  ;;  %s2173_s18 = sshll.u32 %s2501_s29, 10 }
  0x1f   : > { %s303_s11 = scalar_lea.vmem %s3485_s0, %s2341_s21  ;;  %s295_s19 = scalar_lea.vmem [#allocation3], %s3366_s17 }
  0x20   : > { %v304_v10 = vld [vmem:[%s303_s11] sm:$0xff]  ;;  %v2092_v11 = vld [vmem:[%s303_s11 + $0x8] sm:$0xff]  ;;  %v2093_v12 = vld [vmem:[%s303_s11 + $0x10] sm:$0xff]  ;;  %511 = vperm.xlu0 %2405, %v501_v8   ;;  %521 = vperm.xlu1 %2406, %v503_v9   ;;  %s2007_s20 = sshll.u32 %s295_s19, 4  ;;  %s3433_s22 = scalar_lea.hbm %s3492_s7, %s2173_s18  ;;  %s3435_s20 = int_to_ptr.vmem [resolvable:$true] %s2007_s20 }
  0x21   : > { %v309_v13 = vrot.slane %v304_v10, 4  ;;  %v317_v14 = vrot.slane %v2092_v11, 4  ;;  %v324_v15 = vrot.slane %v2093_v12, 4  ;;  %v331_v16 = vmul.f32 %v304_v10, %v304_v10  ;;  %s3439_s23 = scalar_lea.sflag [#allocation4], %s293_s16  ;;  %s2431_s24 = scalar_lea.vmem %s3435_s20, 1024 }
  0x22   : > { %v332_v17 = vmul.f32 %v2092_v11, %v2092_v11  ;;  %v334_v18 = vmul.f32 %v2093_v12, %v2093_v12  ;;  %v373_v19 = vrot.slane %v304_v10, %v2626_v7  ;;  %v379_v20 = vrot.slane %v2092_v11, %v2626_v7  ;;  %p2432_p12 = scmp.ne.s32.totalorder %s3435_s20, %s2431_s24  ;;  %s2515_s25 = smov [#allocation3]  }
  0x23   : > { %v310_v23 = vadd.f32 %v309_v13, %v304_v10  ;;  %v318_v24 = vadd.f32 %v2092_v11, %v317_v14  ;;  %v325_v25 = vadd.f32 %v2093_v12, %v324_v15  ;;  %v386_v26 = vrot.slane %v2093_v12, %v2626_v7  ;;  %s2435_s6 = sshll.u32 %s2515_s25, 4  ;;  %s2436_s6 = int_to_ptr.vmem [resolvable:$false] %s2435_s6 }
  0x24   : > { %v333_v27 = vadd.f32 %v332_v17, %v331_v16  ;;  %v374_v28 = vsub.f32 %v373_v19, %v304_v10  ;;  %v380_v29 = vsub.f32 %v379_v20, %v2092_v11  ;;  %957 = vperm.xlu0 %2405, %v947_v21   ;;  %962 = vperm.xlu1 %2406, %v948_v22   ;;  %p2433_p13 = pnand %p2432_p12, %p2601_p4  ;;  %s2437_s9 = scalar_lea.vmem %s2436_s6, 2048 }
  0x25   : > { %v311_v30 = vrot.slane %v310_v23, 2  ;;  %v319_v31 = vrot.slane %v318_v24, 2  ;;  %v326_v32 = vrot.slane %v325_v25, 2  ;;  %v387_v33 = vsub.f32 %v386_v26, %v2093_v12  ;;  %p2438_p1 = scmp.lt.s32.totalorder %s3435_s20, %s2436_s6  ;;  %p2439_p2 = scmp.lt.s32.totalorder %s2437_s9, %s2431_s24 }
  0x26   : > { %v335_v34 = vadd.f32 %v334_v18, %v333_v27  ;;  %v375_v35 = vmul.f32 %v374_v28, %v374_v28  ;;  %v381_v36 = vmul.f32 %v380_v29, %v380_v29  ;;  %p2434_p0 = pneg %p2433_p13 }
  0x27   : > { %v312_v39 = vadd.f32 %v311_v30, %v310_v23  ;;  %v320_v40 = vadd.f32 %v319_v31, %v318_v24  ;;  %v327_v41 = vadd.f32 %v326_v32, %v325_v25  ;;  %v388_v42 = vmul.f32 %v387_v33, %v387_v33  ;;  %p2440_p3 = por %p2439_p2, %p2438_p1 }
  0x28   : > { %v382_v46 = vadd.f32 %v381_v36, %v375_v35  ;;  %967 = vperm.xlu0 %2405, %v949_v37   ;;  %972 = vperm.xlu1 %2406, %v950_v38   ;;  %2407 = vrsqrt.f32 %v335_v34  ;;  %vm338_vm0 = vcmp.eq.f32.partialorder %v335_v34, inf  ;;  %v341_v16 = vand.u32 2147483648, %v335_v34 }
  0x29   : > { %v313_v43 = vrot.slane %v312_v39, 1  ;;  %v321_v44 = vrot.slane %v320_v40, 1  ;;  %v328_v45 = vrot.slane %v327_v41, 1  ;;  %vm340_vm2 = vcmp.eq.f32.partialorder %v335_v34, 0.0  ;;  %p2441_p5 = pnand %p2440_p3, %p2434_p0 }
  0x2a   : > { %v389_v52 = vadd.f32 %v388_v42, %v382_v46 }
  0x2b   : > { %v314_v49 = vadd.f32 %v313_v43, %v312_v39  ;;  %v322_v50 = vadd.f32 %v321_v44, %v320_v40  ;;  %v329_v51 = vadd.f32 %v328_v45, %v327_v41 }
  0x2c   : > { %2409 = vrsqrt.f32 %v389_v52  ;;  %977 = vperm.xlu0 %2405, %v951_v47   ;;  %982 = vperm.xlu1 %2406, %v952_v48   ;;  %vm392_vm1 = vcmp.eq.f32.partialorder %v389_v52, inf  ;;  %vm394_vm3 = vcmp.eq.f32.partialorder %v389_v52, 0.0 }
  0x2d   : > { %v316_v53 = vmul.f32 0.125, %v314_v49  ;;  %v323_v54 = vmul.f32 0.125, %v322_v50  ;;  %v330_v55 = vmul.f32 0.125, %v329_v51 }
  0x2f   : > { %v343_v58 = vmul.f32 %v316_v53, %v316_v53  ;;  %v344_v59 = vmul.f32 %v323_v54, %v323_v54  ;;  %v346_v60 = vmul.f32 %v330_v55, %v330_v55  ;;  %v355_v61 = vsub.f32 %v304_v10, %v316_v53 }
  0x30   : > { %v357_v62 = vsub.f32 %v2092_v11, %v323_v54  ;;  %v360_v63 = vsub.f32 %v2093_v12, %v330_v55  ;;  %987 = vperm.xlu0 %2405, %v953_v56   ;;  %992 = vperm.xlu1 %2406, %v954_v57   ;;  %v395_v11 = vand.u32 2147483648, %v389_v52  ;;  %v496_v55 = vld [vmem:[%s3486_s1] sm:$0xff] }
  0x31   : > { %v345_v0 = vadd.f32 %v344_v59, %v343_v58  ;;  %v356_v1 = vmul.f32 %v355_v61, %v355_v61 }
  0x32   : > { %v358_v2 = vmul.f32 %v357_v62, %v357_v62  ;;  %v361_v4 = vmul.f32 %v360_v63, %v360_v63  ;;  %v2408_v6 = vpop.eup %2407 }
  0x33   : > { %v347_v5 = vadd.f32 %v346_v60, %v345_v0  ;;  %v337_v14 = vmul.f32 %v2408_v6, %v335_v34  ;;  %v497_v0 = vld [vmem:[%s3486_s1 + $0x8] sm:$0xff] }
  0x34   : > { %v359_v8 = vadd.f32 %v358_v2, %v356_v1 }
  0x35   : > { %2411 = vrsqrt.f32 %v347_v5  ;;  %v339_v10 = vsel %vm338_vm0, %v335_v34, %v337_v14  ;;  %vm350_vm4 = vcmp.eq.f32.partialorder %v347_v5, inf  ;;  %v353_v19 = vand.u32 2147483648, %v347_v5 }
  0x36   : > { %v362_v9 = vadd.f32 %v361_v4, %v359_v8  ;;  %v2410_v13 = vpop.eup %2409  ;;  %v2664_v18 = vsel %vm340_vm2, %v341_v16, %v339_v10  ;;  %vm352_vm6 = vcmp.eq.f32.partialorder %v347_v5, 0.0  ;;  %vm1524_vm0 = vcmask 523264  }
  0x37   : > { %v391_v15 = vmul.f32 %v2410_v13, %v389_v52  ;;  %v421_v25 = vrot.slane %v2664_v18, 7  ;;  %v2096_v28 = vrot.slane %v2664_v18, 10  ;;  %v2095_v32 = vrot.slane %v2664_v18, 9 }
  0x38   : > { %2413 = vrsqrt.f32 %v362_v9  ;;  %vm365_vm12 = vcmp.eq.f32.partialorder %v362_v9, inf  ;;  %v368_v24 = vand.u32 2147483648, %v362_v9  ;;  %vm367_vm14 = vcmp.eq.f32.partialorder %v362_v9, 0.0 }
  0x39   : > { %v393_v12 = vsel %vm392_vm1, %v389_v52, %v391_v15  ;;  %v2099_v35 = vrot.slane %v2664_v18, 13  ;;  %v2098_v36 = vrot.slane %v2664_v18, 12  ;;  %v2097_v13 = vrot.slane %v2664_v18, 11  ;;  %v498_v15 = vld [vmem:[%s3486_s1 + $0x10] sm:$0xff] }
  0x3a   : > { %v2666_v21 = vsel %vm394_vm3, %v395_v11, %v393_v12  ;;  %v499_v12 = vld [vmem:[%s3486_s1 + $0x18] sm:$0xff]  ;;  %vm2514_vm1 = vmmov 0  }
  0x3b   : > { %v2100_v30 = vrot.slane %v2666_v21, 7  ;;  %v410_v31 = vrot.slane %v2666_v21, 6  ;;  %v2102_v34 = vrot.slane %v2666_v21, 9  ;;  %v2104_v40 = vrot.slane %v2666_v21, 11 }
  0x3c   : > { %v2103_v10 = vrot.slane %v2666_v21, 10 }
  0x3d   : > { %v440_v39 = vrot.slane %v410_v31, 6 }
  0x3f   : > { %v2412_v17 = vpop.eup %2411 }
  0x40   : > { %v349_v20 = vmul.f32 %v2412_v17, %v347_v5 }
  0x42   : > { %v2414_v22 = vpop.eup %2413  ;;  %v351_v23 = vsel %vm350_vm4, %v347_v5, %v349_v20 }
  0x43   : > { %v354_v26 = vsel %vm352_vm6, %v353_v19, %v351_v23  ;;  %v364_v27 = vmul.f32 %v2414_v22, %v362_v9 }
  0x44   : > { %v419_v29 = vrot.slane %v354_v26, 7 }
  0x45   : > { %v366_v33 = vsel %vm365_vm12, %v362_v9, %v364_v27 }
  0x46   : > { %v2676_v37 = vsel %vm367_vm14, %v368_v24, %v366_v33  ;;  %v463_v38 = vsel %vm462_vm5, %v2664_v18, %v419_v29 }
  0x47   : > { %v2682_v41 = vrot.slane %v2676_v37, 3  ;;  %v2105_v42 = vrot.slane %v2676_v37, 6  ;;  %v466_v43 = vsel %vm464_vm7, %v463_v38, %v2664_v18  ;;  %v416_v44 = vrot.slane %v2676_v37, 5 }
  0x48   : > { %v474_v45 = vsel %vm472_vm8, %v466_v43, %v2100_v30  ;;  %v465_v46 = vsel %vm464_vm7, %v463_v38, %v421_v25  ;;  %v468_v47 = vsel %vm464_vm7, %v463_v38, %v2096_v28  ;;  %v2106_v48 = vrot.slane %v2676_v37, 7 }
  0x49   : > { %v482_v49 = vsel %vm480_vm9, %v474_v45, %v2105_v42  ;;  %v473_v50 = vsel %vm472_vm8, %v465_v46, %v410_v31  ;;  %v450_v51 = vrot.slane %v2682_v41, 5  ;;  %v476_v52 = vsel %vm472_vm8, %v468_v47, %v2102_v34 }
  0x4a   : > { %v490_v53 = vsel %vm488_vm10, %v482_v49, %v2682_v41  ;;  %v481_v54 = vsel %vm480_vm9, %v473_v50, %v416_v44  ;;  %v467_v56 = vsel %vm464_vm7, %v463_v38, %v2095_v32  ;;  %v2108_v57 = vrot.slane %v2676_v37, 11 }
  0x4b   : > { %2109 = vmatprep.subr.msk.mxu0 %vm537_vm11, %v490_v53  ;;  %v489_v58 = vsel %vm488_vm10, %v481_v54, %v2682_v41  ;;  %v484_v59 = vsel %vm480_vm9, %v476_v52, %v450_v51  ;;  %v475_v60 = vsel %vm472_vm8, %v467_v56, %v2666_v21  ;;  %v471_v61 = vsel %vm464_vm7, %v463_v38, %v2099_v35 }
  0x4c   : > { %2110 = vmatpush1.msk.msra.mxu0 %vm537_vm11, %v489_v58  ;;  %v492_v62 = vsel %vm488_vm10, %v484_v59, %v2682_v41  ;;  %v483_v63 = vsel %vm480_vm9, %v475_v60, %v2106_v48  ;;  %v479_v1 = vsel %vm472_vm8, %v471_v61, %v440_v39  ;;  %v452_v2 = vrot.slane %v416_v44, 5 }
  0x4d   : > { %2339 = vmatprep.subr.msk.mxu1 %vm537_vm11, %v492_v62  ;;  %2111 = vmatmul.mubr.msk.f32.vlgmr.msra.gmra.mrb[0].mxu0 %vm524_vm13, %v496_v55  ;;  %v491_v4 = vsel %vm488_vm10, %v483_v63, %v2682_v41  ;;  %v487_v5 = vsel %vm480_vm9, %v479_v1, %v2108_v57  ;;  %v470_v6 = vsel %vm464_vm7, %v463_v38, %v2098_v36  ;;  %v2107_v17 = vrot.slane %v2676_v37, 9 }
  0x4e   : > { %2340 = vmatpush1.msk.msra.mxu1 %vm537_vm11, %v491_v4  ;;  %629 = vmatprep.mubr.f32.mxu0 %v3529_v3  ;;  %v495_v8 = vsel %vm488_vm10, %v487_v5, %v2682_v41  ;;  %v478_v9 = vsel %vm472_vm8, %v470_v6, %v2104_v40  ;;  %v469_v11 = vsel %vm464_vm7, %v463_v38, %v2097_v13 }
  0x4f   : > { %2118 = vmatmul.mubr.msk.f32.vlgmr.msra.gmra.mrb[0].mxu1 %vm524_vm13, %v497_v0  ;;  %2200 = vmatprep.subr.msk.mxu1 %vm537_vm11, %v495_v8  ;;  %v486_v14 = vsel %vm480_vm9, %v478_v9, %v452_v2  ;;  %v477_v18 = vsel %vm472_vm8, %v469_v11, %v2103_v10 }
  0x50   : > { %724 = vmatprep.mubr.f32.mxu1 %v3529_v3  ;;  %2201 = vmatpush3.msk.msra.mxu1 %vm537_vm11, %v495_v8  ;;  %v494_v16 = vsel %vm488_vm10, %v486_v14, %v2682_v41  ;;  %v485_v19 = vsel %vm480_vm9, %v477_v18, %v2107_v17 }
  0x51   : > { %2112 = vmatmul.mubr.msk.f32.gmra.mrb[2].mxu0 %vm524_vm13, %v497_v0  ;;  %2115 = vmatprep.subr.msk.mxu0 %vm537_vm11, %v492_v62  ;;  %v493_v20 = vsel %vm488_vm10, %v485_v19, %v2682_v41 }
  0x52   : > { %635 = vmatprep.mubr.f32.mxu0 %v3529_v3  ;;  %2116 = vmatpush1.msk.msra.mxu0 %vm537_vm11, %v491_v4 }
  0x53   : > { %2119 = vmatmul.mubr.msk.f32.gmra.mrb[2].mxu1 %vm524_vm13, %v498_v15  ;;  %2121 = vmatprep.subr.msk.mxu0 %vm537_vm11, %v494_v16 }
  0x54   : > { %730 = vmatprep.mubr.f32.mxu1 %v3529_v3 }
  0x55   : > { %2113 = vmatmul.mubr.msk.f32.gmra.mrb[4].mxu0 %vm524_vm13, %v498_v15 }
  0x56   : > { %641 = vmatprep.mubr.f32.mxu0 %v3529_v3 }
  0x57   : > { %2120 = vmatmul.mubr.msk.f32.gmra.mrb[4].mxu1 %vm524_vm13, %v499_v12 }
  0x58   : > { %2202 = vmatprep.mubr.msk.f32.mxu1 %vm524_vm13, %v496_v55 }
  0x59   : > { %2114 = vmatmul.mubr.msk.f32.gmra.mrb[6].mxu0 %vm524_vm13, %v499_v12 }
  0x5a   : > { %712 = vmatprep.mubr.f32.mxu0 %v3529_v3 }
  0x5b   : > { %2203 = vmatmul.mubr.msk.f32.vlgmr.msra.gmra.mrb[6].mxu1 %vm524_vm13, %v497_v0 }
  0x5c   : > { %2205 = vmatprep.mubr.msk.f32.mxu1 %vm524_vm13, %v498_v15 }
  0x5d   : > { %2117 = vmatmul.mubr.msk.f32.vlgmr.msra.gmra.mrb[8].mxu0 %vm524_vm13, %v496_v55 }
  0x5e   : > { %2122 = vmatpush1.msk.msra.mxu0 %vm537_vm11, %v493_v20  ;;  %801 = vmatprep.mubr.f32.mxu0 %v3529_v3 }
  0x5f   : > { %2206 = vmatmul.mubr.msk.f32.gmra.mrb[8].mxu1 %vm524_vm13, %v499_v12 }
  0x60   : > { %1084 = vmatprep.mubr.f32.mxu1 %v3529_v3 }
  0x61   : > { %2123 = vmatmul.mubr.msk.f32.vlgmr.msra.gmra.mrb[10].mxu0 %vm524_vm13, %v496_v55 }
  0x62   : > { %807 = vmatprep.mubr.f32.mxu0 %v3529_v3 }
  0x65   : > { %2124 = vmatmul.mubr.msk.f32.gmra.mrb[12].mxu0 %vm524_vm13, %v497_v0 }
  0x66   : > { %813 = vmatprep.mubr.f32.mxu0 %v3529_v3 }
  0x69   : > { %2125 = vmatmul.mubr.msk.f32.gmra.mrb[14].mxu0 %vm524_vm13, %v498_v15 }
  0x6a   : > { %819 = vmatprep.mubr.f32.mxu0 %v3529_v3 }
  0x6d   : > { %2126 = vmatmul.mubr.msk.f32.gmra.mrb[16].mxu0 %vm524_vm13, %v499_v12 }
  0x6e   : > { %1197 = vmatprep.mubr.f32.mxu0 %v3529_v3 }
  0x9b   : > { %v2779_v21 = vpop.permute.xlu0 %506  ;;  %v2781_v25 = vpop.permute.xlu1 %516 }
  0x9f   : > { %v2784_v28 = vpop.permute.xlu0 %511  ;;  %v2791_v45 = vpop.permute.xlu1 %521 }
 0x120   : > { %v625_v22 = vpop.f32.mrb[0].mxu0 }
 0x121   : > { %v627_v23 = vpop.f32.mrb[1].mxu0  ;;  %v626_v26 = vadd.f32 %v625_v22, %v2779_v21 }
 0x122   : > { %v720_v24 = vpop.f32.mrb[0].mxu1  ;;  %v628_v29 = vadd.f32 %v627_v23, %v2779_v21 }
 0x123   : > { %v722_v27 = vpop.f32.mrb[1].mxu1  ;;  %v911_v35 = vmax.f32 %v626_v26, 0.0  ;;  %v721_v59 = vadd.f32 %v720_v24, %v2784_v28 }
 0x124   : > { %v631_v30 = vpop.f32.mrb[2].mxu0  ;;  %v912_v39 = vmax.f32 %v628_v29, 0.0  ;;  %v723_v60 = vadd.f32 %v722_v27, %v2784_v28 }
 0x125   : > { %v632_v31 = vadd.f32 %v631_v30, %v2784_v28  ;;  %v633_v32 = vpop.f32.mrb[3].mxu0  ;;  %v920_v20 = vmax.f32 %v721_v59, 0.0  ;;  %v942_v59 = vld [vmem:[%s3488_s3 + $0x18] sm:$0xff] }
 0x126   : > { %v634_v33 = vadd.f32 %v633_v32, %v2784_v28  ;;  %v726_v34 = vpop.f32.mrb[2].mxu1  ;;  %v921_v26 = vmax.f32 %v723_v60, 0.0 }
 0x127   : > { %v918_v36 = vmax.f32 %v632_v31, 0.0  ;;  %v727_v37 = vadd.f32 %v726_v34, %v2781_v25  ;;  %v728_v38 = vpop.f32.mrb[3].mxu1 }
 0x128   : > { %v919_v40 = vmax.f32 %v634_v33, 0.0  ;;  %v637_v41 = vpop.f32.mrb[4].mxu0  ;;  %v729_v42 = vadd.f32 %v728_v38, %v2781_v25 }
 0x129   : > { %v2249_v43 = vpack.c.bf16 %v918_v36, %v911_v35  ;;  %v639_v44 = vpop.f32.mrb[5].mxu0  ;;  %v638_v48 = vadd.f32 %v637_v41, %v2781_v25  ;;  %v927_v49 = vmax.f32 %v727_v37, 0.0  ;;  %v2810_v35 = vld [vmem:[%s3488_s3] sm:$0xff] }
 0x12a   : > { %v2247_v46 = vpack.c.bf16 %v919_v40, %v912_v39  ;;  %v732_v47 = vpop.f32.mrb[4].mxu1  ;;  %v640_v52 = vadd.f32 %v639_v44, %v2781_v25  ;;  %v928_v53 = vmax.f32 %v729_v42, 0.0  ;;  %v2821_v44 = vld [vmem:[%s3488_s3 + $0x8] sm:$0xff] }
 0x12b   : > { %v733_v50 = vadd.f32 %v732_v47, %v2791_v45  ;;  %v734_v51 = vpop.f32.mrb[5].mxu1  ;;  %v925_v0 = vmax.f32 %v638_v48, 0.0 }
 0x12c   : > { %v643_v54 = vpop.f32.mrb[6].mxu0  ;;  %v735_v55 = vadd.f32 %v734_v51, %v2791_v45  ;;  %2248 = vmatprep.subr.bf16.mxu1 %v2247_v46  ;;  %v926_v6 = vmax.f32 %v640_v52, 0.0 }
 0x12d   : > { %v934_v56 = vmax.f32 %v733_v50, 0.0  ;;  %v644_v57 = vadd.f32 %v643_v54, %v2791_v45  ;;  %v645_v58 = vpop.f32.mrb[7].mxu0  ;;  %2250 = vmatpush1.bf16.msra.mxu1 %v2249_v43 }
 0x12e   : > { %v935_v61 = vmax.f32 %v735_v55, 0.0  ;;  %v646_v62 = vadd.f32 %v645_v58, %v2791_v45  ;;  %v2204_v63 = vpop.f32.mrb[6].mxu1 }
 0x12f   : > { %v2261_v1 = vpack.c.bf16 %v934_v56, %v927_v49  ;;  %v932_v2 = vmax.f32 %v644_v57, 0.0  ;;  %v898_v4 = vadd.f32 %v2204_v63, %v2784_v28  ;;  %v892_v5 = vpop.f32.mrb[7].mxu1 }
 0x130   : > { %v2259_v8 = vpack.c.bf16 %v935_v61, %v928_v53  ;;  %v933_v9 = vmax.f32 %v646_v62, 0.0  ;;  %v893_v13 = vadd.f32 %v892_v5, %v2779_v21  ;;  %v714_v14 = vpop.f32.mrb[8].mxu0  ;;  %v941_v53 = vld [vmem:[%s3488_s3 + $0x10] sm:$0xff]  ;;  %v946_v5 = vld [vmem:[%s3488_s3 + $0x38] sm:$0xff] }
 0x131   : > { %v2253_v15 = vpack.c.bf16 %v932_v2, %v925_v0  ;;  %v924_v16 = vmax.f32 %v898_v4, 0.0  ;;  %v715_v10 = vadd.f32 %v714_v14, %v2779_v21  ;;  %v716_v11 = vpop.f32.mrb[9].mxu0  ;;  %v944_v2 = vld [vmem:[%s3488_s3 + $0x28] sm:$0xff]  ;;  %v945_v4 = vld [vmem:[%s3488_s3 + $0x30] sm:$0xff]  ;;  %v2909_v14 = vpop.permute.xlu1 %962 }
 0x132   : > { %v2251_v12 = vpack.c.bf16 %v933_v9, %v926_v6  ;;  %v917_v17 = vmax.f32 %v893_v13, 0.0  ;;  %v717_v18 = vadd.f32 %v716_v11, %v2779_v21  ;;  %v2207_v19 = vpop.f32.mrb[8].mxu1  ;;  %v1521_v6 = vld [vmem:[#allocation2] sm:$0x1]  ;;  %v2907_v13 = vpop.permute.xlu0 %957 }
 0x133   : > { %v913_v22 = vmax.f32 %v715_v10, 0.0  ;;  %v908_v23 = vadd.f32 %v2207_v19, %v2791_v45  ;;  %v902_v24 = vpop.f32.mrb[9].mxu1  ;;  %2342 = vpush %v1521_v6 }
 0x134   : > { %v2271_v27 = vpack.c.bf16 %v924_v16, %v917_v17  ;;  %v914_v29 = vmax.f32 %v717_v18, 0.0  ;;  %v903_v30 = vadd.f32 %v902_v24, %v2781_v25  ;;  %v803_v31 = vpop.f32.mrb[10].mxu0  ;;  %2252 = vmatprep.subr.bf16.mxu1 %v2251_v12 }
 0x135   : > { %v2257_v32 = vpack.c.bf16 %v920_v20, %v913_v22  ;;  %v938_v33 = vmax.f32 %v908_v23, 0.0  ;;  %v805_v34 = vpop.f32.mrb[11].mxu0  ;;  %2254 = vmatpush1.bf16.msra.mxu1 %v2253_v15  ;;  %v804_v38 = vadd.f32 %v803_v31, %v2779_v21  ;;  %v2933_v31 = vpop.permute.xlu1 %972 }
 0x136   : > { %v2255_v36 = vpack.c.bf16 %v921_v26, %v914_v29  ;;  %v931_v37 = vmax.f32 %v903_v30, 0.0  ;;  %v806_v40 = vadd.f32 %v805_v34, %v2779_v21  ;;  %v2931_v30 = vpop.permute.xlu0 %967 }
 0x137   : > { %v915_v21 = vmax.f32 %v804_v38, 0.0 }
 0x138   : > { %v2275_v39 = vpack.c.bf16 %v938_v33, %v931_v37  ;;  %v809_v41 = vpop.f32.mrb[12].mxu0  ;;  %2132 = vmatmul.mubr.msk.f32.vlgmr.msra.gmra.mrb[10].mxu1 %vm995_vm15, %v2810_v35  ;;  %2256 = vmatprep.subr.bf16.mxu0 %v2255_v36  ;;  %v916_v48 = vmax.f32 %v806_v40, 0.0 }
 0x139   : > { %v810_v42 = vadd.f32 %v809_v41, %v2784_v28  ;;  %v811_v43 = vpop.f32.mrb[13].mxu0  ;;  %2258 = vmatpush1.bf16.msra.mxu0 %v2257_v32  ;;  %1090 = vmatprep.mubr.f32.mxu1 %v3529_v3 }
 0x13a   : > { %v812_v46 = vadd.f32 %v811_v43, %v2784_v28  ;;  %2260 = vmatprep.subr.bf16.mxu0 %v2259_v8 }
 0x13b   : > { %v922_v47 = vmax.f32 %v810_v42, 0.0 }
 0x13c   : > { %v923_v49 = vmax.f32 %v812_v46, 0.0  ;;  %v815_v50 = vpop.f32.mrb[14].mxu0  ;;  %2133 = vmatmul.mubr.msk.f32.gmra.mrb[12].mxu1 %vm995_vm15, %v2821_v44 }
 0x13d   : > { %v2265_v51 = vpack.c.bf16 %v922_v47, %v915_v21  ;;  %v817_v52 = vpop.f32.mrb[15].mxu0  ;;  %2262 = vmatpush1.bf16.msra.mxu0 %v2261_v1  ;;  %1096 = vmatprep.mubr.f32.mxu1 %v3529_v3  ;;  %v816_v28 = vadd.f32 %v815_v50, %v2781_v25 }
 0x13e   : > { %v2263_v54 = vpack.c.bf16 %v923_v49, %v916_v48  ;;  %2272 = vmatprep.subr.bf16.mxu0 %v2271_v27  ;;  %v818_v55 = vadd.f32 %v817_v52, %v2781_v25 }
 0x13f   : > { %v929_v25 = vmax.f32 %v816_v28, 0.0 }
 0x140   : > { %v821_v56 = vpop.f32.mrb[16].mxu0  ;;  %2134 = vmatmul.mubr.msk.f32.gmra.mrb[14].mxu1 %vm995_vm15, %v941_v53  ;;  %2140 = vmatmul.mubr.msk.f32.vlgmr.msra.gmra.mrb[18].mxu0 %vm995_vm15, %v2810_v35  ;;  %v930_v62 = vmax.f32 %v818_v55, 0.0 }
 0x141   : > { %v822_v57 = vadd.f32 %v821_v56, %v2791_v45  ;;  %2264 = vmatprep.subr.bf16.mxu1 %v2263_v54  ;;  %v823_v58 = vpop.f32.mrb[17].mxu0  ;;  %2274 = vmatpush3.bf16.msra.mxu0 %v2271_v27 }
 0x142   : > { %v824_v60 = vadd.f32 %v823_v58, %v2791_v45  ;;  %2266 = vmatpush1.bf16.msra.mxu1 %v2265_v51  ;;  %2276 = vmatprep.subr.bf16.mxu0 %v2275_v39  ;;  %v943_v45 = vld [vmem:[%s3488_s3 + $0x20] sm:$0xff]  ;;  %v2979_v58 = vpop.permute.xlu0 %977 }
 0x143   : > { %v936_v61 = vmax.f32 %v822_v57, 0.0  ;;  %1102 = vmatprep.mubr.f32.mxu1 %v3529_v3  ;;  %1203 = vmatprep.mubr.f32.mxu0 %v3529_v3 }
 0x144   : > { %v937_v63 = vmax.f32 %v824_v60, 0.0  ;;  %2135 = vmatmul.mubr.msk.f32.gmra.mrb[16].mxu1 %vm995_vm15, %v942_v59  ;;  %2141 = vmatmul.mubr.msk.f32.gmra.mrb[20].mxu0 %vm995_vm15, %v2821_v44 }
 0x145   : > { %v2269_v0 = vpack.c.bf16 %v936_v61, %v929_v25  ;;  %2278 = vmatpush3.bf16.msra.mxu0 %v2275_v39  ;;  %1108 = vmatprep.mubr.f32.mxu1 %v3529_v3 }
 0x146   : > { %v2267_v1 = vpack.c.bf16 %v937_v63, %v930_v62  ;;  %1209 = vmatprep.mubr.f32.mxu0 %v3529_v3 }
 0x148   : > { %2136 = vmatmul.mubr.msk.f32.gmra.mrb[18].mxu1 %vm995_vm15, %v943_v45  ;;  %2142 = vmatmul.mubr.msk.f32.gmra.mrb[22].mxu0 %vm995_vm15, %v941_v53 }
 0x149   : > { %2268 = vmatprep.subr.bf16.mxu1 %v2267_v1  ;;  %1114 = vmatprep.mubr.f32.mxu1 %v3529_v3 }
 0x14a   : > { %2270 = vmatpush1.bf16.msra.mxu1 %v2269_v0  ;;  %1215 = vmatprep.mubr.f32.mxu0 %v3529_v3 }
 0x14c   : > { %2137 = vmatmul.mubr.msk.f32.gmra.mrb[20].mxu1 %vm995_vm15, %v944_v2  ;;  %2143 = vmatmul.mubr.msk.f32.gmra.mrb[24].mxu0 %vm995_vm15, %v942_v59 }
 0x14d   : > { %1120 = vmatprep.mubr.f32.mxu1 %v3529_v3  ;;  %1221 = vmatprep.mubr.f32.mxu0 %v3529_v3 }
 0x150   : > { %2138 = vmatmul.mubr.msk.f32.gmra.mrb[22].mxu1 %vm995_vm15, %v945_v4  ;;  %2144 = vmatmul.mubr.msk.f32.gmra.mrb[26].mxu0 %vm995_vm15, %v943_v45 }
 0x151   : > { %1126 = vmatprep.mubr.f32.mxu1 %v3529_v3  ;;  %1227 = vmatprep.mubr.f32.mxu0 %v3529_v3 }
 0x154   : > { %2139 = vmatmul.mubr.msk.f32.gmra.mrb[24].mxu1 %vm995_vm15, %v946_v5  ;;  %2145 = vmatmul.mubr.msk.f32.gmra.mrb[28].mxu0 %vm995_vm15, %v944_v2 }
 0x155   : > { %1233 = vmatprep.mubr.f32.mxu0 %v3529_v3  ;;  %1310 = vmatprep.mubr.f32.mxu1 %v3529_v3 }
 0x158   : > { %2146 = vmatmul.mubr.msk.f32.gmra.mrb[30].mxu0 %vm995_vm15, %v945_v4  ;;  %2148 = vmatmul.mubr.msk.f32.vlgmr.msra.gmra.mrb[26].mxu1 %vm995_vm15, %v2810_v35 }
 0x159   : > { %1239 = vmatprep.mubr.f32.mxu0 %v3529_v3  ;;  %1316 = vmatprep.mubr.f32.mxu1 %v3529_v3 }
 0x15c   : > { %2147 = vmatmul.mubr.msk.f32.gmra.mrb[32].mxu0 %vm995_vm15, %v946_v5  ;;  %2149 = vmatmul.mubr.msk.f32.gmra.mrb[28].mxu1 %vm995_vm15, %v2821_v44 }
 0x15d   : > { %1322 = vmatprep.mubr.f32.mxu1 %v3529_v3  ;;  %2216 = vmatprep.mubr.msk.f32.mxu0 %vm995_vm15, %v2810_v35 }
 0x160   : > { %2150 = vmatmul.mubr.msk.f32.gmra.mrb[30].mxu1 %vm995_vm15, %v941_v53  ;;  %2217 = vmatmul.mubr.msk.f32.vlgmr.msra.gmra.mrb[34].mxu0 %vm995_vm15, %v2821_v44 }
 0x161   : > { %1328 = vmatprep.mubr.f32.mxu1 %v3529_v3  ;;  %2219 = vmatprep.mubr.msk.f32.mxu0 %vm995_vm15, %v941_v53 }
 0x164   : > { %2151 = vmatmul.mubr.msk.f32.gmra.mrb[32].mxu1 %vm995_vm15, %v942_v59  ;;  %2220 = vmatmul.mubr.msk.f32.gmra.mrb[36].mxu0 %vm995_vm15, %v942_v59  ;;  %v2981_v59 = vpop.permute.xlu1 %982  ;;  %s2343_s13 = spop %2342 }
 0x165   : > { %1334 = vmatprep.mubr.f32.mxu1 %v3529_v3  ;;  %2222 = vmatprep.mubr.msk.f32.mxu0 %vm995_vm15, %v943_v45 }
 0x168   : > { %2152 = vmatmul.mubr.msk.f32.gmra.mrb[34].mxu1 %vm995_vm15, %v943_v45  ;;  %2223 = vmatmul.mubr.msk.f32.gmra.mrb[38].mxu0 %vm995_vm15, %v944_v2 }
 0x169   : > { %1340 = vmatprep.mubr.f32.mxu1 %v3529_v3  ;;  %2225 = vmatprep.mubr.msk.f32.mxu0 %vm995_vm15, %v945_v4 }
 0x16c   : > { %2153 = vmatmul.mubr.msk.f32.gmra.mrb[36].mxu1 %vm995_vm15, %v944_v2  ;;  %2226 = vmatmul.mubr.msk.f32.gmra.mrb[40].mxu0 %vm995_vm15, %v946_v5 }
 0x16d   : > { %1346 = vmatprep.mubr.f32.mxu1 %v3529_v3  ;;  %1592 = vmatprep.mubr.f32.mxu0 %v3529_v3 }
 0x170   : > { %2154 = vmatmul.mubr.msk.f32.gmra.mrb[38].mxu1 %vm995_vm15, %v945_v4 }
 0x171   : > { %1352 = vmatprep.mubr.f32.mxu1 %v3529_v3 }
 0x174   : > { %2155 = vmatmul.mubr.msk.f32.gmra.mrb[40].mxu1 %vm995_vm15, %v946_v5 }
 0x175   : > { %1663 = vmatprep.mubr.f32.mxu1 %v3529_v3 }
 0x20b   : > { %v1086_v8 = vpop.f32.mrb[10].mxu1 }
 0x20c   : > { %v1088_v9 = vpop.f32.mrb[11].mxu1  ;;  %v2915_v10 = vadd.f32 %v1086_v8, %v2907_v13 }
 0x20d   : > { %v2912_v15 = vadd.f32 %v1088_v9, %v2907_v13 }
 0x20e   : > { %v3528_v24 = vmax.f32 %v2915_v10, 0.0 }
 0x20f   : > { %v1092_v16 = vpop.f32.mrb[12].mxu1  ;;  %v3512_v19 = vmax.f32 %v2912_v15, 0.0 }
 0x210   : > { %v2918_v11 = vadd.f32 %v1092_v16, %v2909_v14  ;;  %v1094_v12 = vpop.f32.mrb[13].mxu1 }
 0x211   : > { %v2921_v17 = vadd.f32 %v1094_v12, %v2909_v14 }
 0x212   : > { %v3519_v18 = vmax.f32 %v2918_v11, 0.0 }
 0x213   : > { %v3509_v20 = vmax.f32 %v2921_v17, 0.0  ;;  %v1098_v22 = vpop.f32.mrb[14].mxu1  ;;  %v1199_v23 = vpop.f32.mrb[18].mxu0 }
 0x214   : > { %v1100_v26 = vpop.f32.mrb[15].mxu1  ;;  %v1201_v27 = vpop.f32.mrb[19].mxu0  ;;  %v2281_v32 = vpack.c.bf16 %v3519_v18, %v3528_v24  ;;  %v2946_v37 = vadd.f32 %v1098_v22, %v2931_v30  ;;  %v2949_v38 = vadd.f32 %v1199_v23, %v2907_v13 }
 0x215   : > { %v2279_v29 = vpack.c.bf16 %v3509_v20, %v3512_v19  ;;  %v2940_v33 = vadd.f32 %v1100_v26, %v2931_v30  ;;  %v2943_v34 = vadd.f32 %v1201_v27, %v2907_v13 }
 0x216   : > { %v3518_v53 = vmax.f32 %v2946_v37, 0.0  ;;  %v3500_v54 = vmax.f32 %v2949_v38, 0.0 }
 0x217   : > { %v1104_v35 = vpop.f32.mrb[16].mxu1  ;;  %v1205_v36 = vpop.f32.mrb[20].mxu0  ;;  %2280 = vmatprep.subr.bf16.mxu0 %v2279_v29  ;;  %v3508_v47 = vmax.f32 %v2940_v33, 0.0  ;;  %v3496_v48 = vmax.f32 %v2943_v34, 0.0 }
 0x218   : > { %v2952_v39 = vadd.f32 %v1104_v35, %v2933_v31  ;;  %v2955_v40 = vadd.f32 %v1205_v36, %v2909_v14  ;;  %v1106_v41 = vpop.f32.mrb[17].mxu1  ;;  %v1207_v42 = vpop.f32.mrb[21].mxu0  ;;  %2282 = vmatpush1.bf16.msra.mxu0 %v2281_v32 }
 0x219   : > { %v2958_v43 = vadd.f32 %v1106_v41, %v2933_v31  ;;  %v2961_v44 = vadd.f32 %v1207_v42, %v2909_v14 }
 0x21a   : > { %v3517_v46 = vmax.f32 %v2952_v39, 0.0  ;;  %v3499_v21 = vmax.f32 %v2955_v40, 0.0 }
 0x21b   : > { %v3503_v49 = vmax.f32 %v2958_v43, 0.0  ;;  %v3495_v50 = vmax.f32 %v2961_v44, 0.0  ;;  %v1110_v51 = vpop.f32.mrb[18].mxu1  ;;  %v1211_v52 = vpop.f32.mrb[22].mxu0 }
 0x21c   : > { %v1112_v28 = vpop.f32.mrb[19].mxu1  ;;  %v1213_v55 = vpop.f32.mrb[23].mxu0  ;;  %v2285_v60 = vpack.c.bf16 %v3517_v46, %v3518_v53  ;;  %v2297_v25 = vpack.c.bf16 %v3499_v21, %v3500_v54  ;;  %v2992_v61 = vadd.f32 %v1110_v51, %v2979_v58  ;;  %v3001_v1 = vadd.f32 %v1211_v52, %v2931_v30 }
 0x21d   : > { %v2283_v56 = vpack.c.bf16 %v3503_v49, %v3508_v47  ;;  %v2295_v57 = vpack.c.bf16 %v3495_v50, %v3496_v48  ;;  %v2995_v62 = vadd.f32 %v1112_v28, %v2979_v58  ;;  %v2998_v63 = vadd.f32 %v1213_v55, %v2931_v30  ;;  %v3031_v28 = vpop.permute.xlu0 %987  ;;  %v3033_v55 = vpop.permute.xlu1 %992 }
 0x21e   : > { %v3516_v35 = vmax.f32 %v2992_v61, 0.0  ;;  %v3498_v36 = vmax.f32 %v3001_v1, 0.0 }
 0x21f   : > { %v1116_v0 = vpop.f32.mrb[20].mxu1  ;;  %v1217_v45 = vpop.f32.mrb[24].mxu0  ;;  %2284 = vmatprep.subr.bf16.mxu0 %v2283_v56  ;;  %2296 = vmatprep.subr.bf16.mxu1 %v2295_v57  ;;  %v3502_v22 = vmax.f32 %v2995_v62, 0.0  ;;  %v3494_v23 = vmax.f32 %v2998_v63, 0.0 }
 0x220   : > { %v3004_v2 = vadd.f32 %v1116_v0, %v2981_v59  ;;  %v3007_v4 = vadd.f32 %v1217_v45, %v2933_v31  ;;  %v1118_v5 = vpop.f32.mrb[21].mxu1  ;;  %v1219_v6 = vpop.f32.mrb[25].mxu0  ;;  %2286 = vmatpush1.bf16.msra.mxu0 %v2285_v60  ;;  %2298 = vmatpush1.bf16.msra.mxu1 %v2297_v25 }
 0x221   : > { %v3010_v8 = vadd.f32 %v1118_v5, %v2981_v59  ;;  %v3013_v9 = vadd.f32 %v1219_v6, %v2933_v31 }
 0x222   : > { %v3515_v16 = vmax.f32 %v3004_v2, 0.0  ;;  %v3497_v12 = vmax.f32 %v3007_v4, 0.0 }
 0x223   : > { %v3501_v26 = vmax.f32 %v3010_v8, 0.0  ;;  %v3493_v27 = vmax.f32 %v3013_v9, 0.0  ;;  %v1122_v29 = vpop.f32.mrb[22].mxu1  ;;  %v1223_v32 = vpop.f32.mrb[26].mxu0 }
 0x224   : > { %v1124_v41 = vpop.f32.mrb[23].mxu1  ;;  %v1225_v42 = vpop.f32.mrb[27].mxu0  ;;  %v2289_v56 = vpack.c.bf16 %v3515_v16, %v3516_v35  ;;  %v2301_v57 = vpack.c.bf16 %v3497_v12, %v3498_v36  ;;  %v3044_v60 = vadd.f32 %v1122_v29, %v3031_v28  ;;  %v3053_v6 = vadd.f32 %v1223_v32, %v2979_v58 }
 0x225   : > { %v2287_v51 = vpack.c.bf16 %v3501_v26, %v3502_v22  ;;  %v2299_v52 = vpack.c.bf16 %v3493_v27, %v3494_v23  ;;  %v3047_v25 = vadd.f32 %v1124_v41, %v3031_v28  ;;  %v3050_v0 = vadd.f32 %v1225_v42, %v2979_v58 }
 0x226   : > { %v3511_v12 = vmax.f32 %v3053_v6, 0.0 }
 0x227   : > { %v1128_v45 = vpop.f32.mrb[24].mxu1  ;;  %v1229_v5 = vpop.f32.mrb[28].mxu0  ;;  %2288 = vmatprep.subr.bf16.mxu0 %v2287_v51  ;;  %2300 = vmatprep.subr.bf16.mxu1 %v2299_v52  ;;  %v3505_v52 = vmax.f32 %v3047_v25, 0.0 }
 0x228   : > { %v3056_v27 = vadd.f32 %v1128_v45, %v3033_v55  ;;  %v3059_v23 = vadd.f32 %v1229_v5, %v2981_v59  ;;  %v1130_v29 = vpop.f32.mrb[25].mxu1  ;;  %v1231_v50 = vpop.f32.mrb[29].mxu0  ;;  %2290 = vmatpush1.bf16.msra.mxu0 %v2289_v56  ;;  %2302 = vmatpush1.bf16.msra.mxu1 %v2301_v57  ;;  %v3507_v45 = vmax.f32 %v3050_v0, 0.0 }
 0x229   : > { %v3062_v41 = vadd.f32 %v1130_v29, %v3033_v55  ;;  %v3065_v42 = vadd.f32 %v1231_v50, %v2981_v59  ;;  %v3514_v29 = vmax.f32 %v3044_v60, 0.0 }
 0x22a   : > { %v3513_v51 = vmax.f32 %v3056_v27, 0.0  ;;  %v3510_v32 = vmax.f32 %v3059_v23, 0.0 }
 0x22b   : > { %v3504_v5 = vmax.f32 %v3062_v41, 0.0  ;;  %v3506_v48 = vmax.f32 %v3065_v42, 0.0  ;;  %v1235_v56 = vpop.f32.mrb[30].mxu0  ;;  %v1312_v57 = vpop.f32.mrb[26].mxu1 }
 0x22c   : > { %v1237_v50 = vpop.f32.mrb[31].mxu0  ;;  %v1314_v36 = vpop.f32.mrb[27].mxu1  ;;  %v2293_v26 = vpack.c.bf16 %v3513_v51, %v3514_v29  ;;  %v2305_v22 = vpack.c.bf16 %v3510_v32, %v3511_v12  ;;  %v3092_v49 = vadd.f32 %v1235_v56, %v3031_v28  ;;  %v3101_v47 = vadd.f32 %v1312_v57, %v2907_v13 }
 0x22d   : > { %v2291_v21 = vpack.c.bf16 %v3504_v5, %v3505_v52  ;;  %v2303_v54 = vpack.c.bf16 %v3506_v48, %v3507_v45  ;;  %v3095_v5 = vadd.f32 %v1237_v50, %v3031_v28  ;;  %v3098_v52 = vadd.f32 %v1314_v36, %v2907_v13  ;;  %v3112_v36 = vld [vmem:[%s3490_s5] sm:$0x1] }
 0x22f   : > { %3569 = vst [vmem:[#allocation6_spill] sm:$0xff] %v3098_v52  ;;  %v1241_v48 = vpop.f32.mrb[32].mxu0  ;;  %v1318_v45 = vpop.f32.mrb[28].mxu1  ;;  %2292 = vmatprep.subr.bf16.mxu0 %v2291_v21  ;;  %2304 = vmatprep.subr.bf16.mxu1 %v2303_v54  ;;  %v3521_v57 = vmax.f32 %v3095_v5, 0.0 }
 0x230   : > { %v3104_v20 = vadd.f32 %v1241_v48, %v3033_v55  ;;  %v3107_v32 = vadd.f32 %v1318_v45, %v2909_v14  ;;  %v1243_v56 = vpop.f32.mrb[33].mxu0  ;;  %v1320_v12 = vpop.f32.mrb[29].mxu1  ;;  %2294 = vmatpush1.bf16.msra.mxu0 %v2293_v26  ;;  %2306 = vmatpush1.bf16.msra.mxu1 %v2305_v22  ;;  %v3523_v22 = vmax.f32 %v3098_v52, 0.0 }
 0x231   : > { %v3115_v21 = vadd.f32 %v1243_v56, %v3033_v55  ;;  %v3118_v54 = vadd.f32 %v1320_v12, %v2909_v14  ;;  %v3525_v12 = vmax.f32 %v3092_v49, 0.0  ;;  %v3527_v56 = vmax.f32 %v3101_v47, 0.0 }
 0x232   : > { %v3524_v48 = vmax.f32 %v3104_v20, 0.0  ;;  %v3526_v45 = vmax.f32 %v3107_v32, 0.0 }
 0x233   : > { %3570 = vst [vmem:[#allocation7_spill] sm:$0xff] %v3118_v54  ;;  %v3520_v26 = vmax.f32 %v3115_v21, 0.0  ;;  %v3522_v50 = vmax.f32 %v3118_v54, 0.0  ;;  %v1324_v19 = vpop.f32.mrb[30].mxu1  ;;  %v2218_v51 = vpop.f32.mrb[34].mxu0  ;;  %2164 = vmatmul.mubr.msk.f32.vlgmr.msra.gmra.mrb[42].mxu0 %vm1524_vm0, %v3112_v36 }
 0x234   : > { %v3131_v29 = vadd.f32 %v2218_v51, %v2909_v14  ;;  %v1326_v16 = vpop.f32.mrb[31].mxu1  ;;  %v1425_v35 = vpop.f32.mrb[35].mxu0  ;;  %1734 = vmatprep.mubr.f32.mxu0 %v3529_v3  ;;  %v2309_v14 = vpack.c.bf16 %v3524_v48, %v3525_v12  ;;  %v2313_v51 = vpack.c.bf16 %v3526_v45, %v3527_v56 }
 0x235   : > { %v2307_v46 = vpack.c.bf16 %v3520_v26, %v3521_v57  ;;  %v2311_v53 = vpack.c.bf16 %v3522_v50, %v3523_v22  ;;  %v3143_v18 = vadd.f32 %v1425_v35, %v2907_v13  ;;  %v3155_v57 = vadd.f32 %v1326_v16, %v2931_v30 }
 0x236   : > { %3571 = vst [vmem:[#allocation8_spill] sm:$0xff] %v3131_v29  ;;  %v3530_v26 = vmax.f32 %v3131_v29, 0.0  ;;  %v3159_v35 = vadd.f32 %v1324_v19, %v2931_v30 }
 0x237   : > { %3572 = vst [vmem:[#allocation9_spill] sm:$0xff] %v3143_v18  ;;  %3573 = vst [vmem:[#allocation10_spill] sm:$0xff] %v3155_v57  ;;  %v3531_v50 = vmax.f32 %v3143_v18, 0.0  ;;  %v1330_v22 = vpop.f32.mrb[32].mxu1  ;;  %v2221_v13 = vpop.f32.mrb[36].mxu0  ;;  %2308 = vmatprep.subr.bf16.mxu1 %v2307_v46  ;;  %2312 = vmatprep.subr.bf16.mxu0 %v2311_v53  ;;  %v2513_v53 = vmov 0.0|0.0  }
 0x238   : > { %v3162_v48 = vadd.f32 %v1330_v22, %v2933_v31  ;;  %v3165_v12 = vadd.f32 %v2221_v13, %v2933_v31  ;;  %v1332_v45 = vpop.f32.mrb[33].mxu1  ;;  %v1435_v56 = vpop.f32.mrb[37].mxu0  ;;  %2310 = vmatpush1.bf16.msra.mxu1 %v2309_v14  ;;  %2314 = vmatpush1.bf16.msra.mxu0 %v2313_v51  ;;  %v3536_v14 = vmax.f32 %v3155_v57, 0.0 }
 0x239   : > { %v2328_v16 = vpack.c.bf16 %v3530_v26, %v3531_v50  ;;  %v3172_v46 = vadd.f32 %v1332_v45, %v2933_v31  ;;  %v3175_v19 = vadd.f32 %v1435_v56, %v2931_v30  ;;  %2327 = vmatprep.subr.bf16.mxu1 %v2513_v53  ;;  %v3578_v50 = vmov 0.0  }
 0x23a   : > { %3574 = vst [vmem:[#allocation11_spill] sm:$0xff] %v3165_v12  ;;  %v3538_v13 = vmax.f32 %v3165_v12, 0.0 }
 0x23b   : > { %3575 = vst [vmem:[#allocation12_spill] sm:$0xff] %v3172_v46  ;;  %3576 = vst [vmem:[#allocation13_spill] sm:$0xff] %v3175_v19  ;;  %v3535_v51 = vmax.f32 %v3172_v46, 0.0  ;;  %v3539_v24 = vmax.f32 %v3175_v19, 0.0  ;;  %v1336_v3 = vpop.f32.mrb[34].mxu1  ;;  %v2224_v26 = vpop.f32.mrb[38].mxu0  ;;  %2165 = vmatmul.mubr.msk.f32.vlgmr.msra.gmra.mrb[42].mxu1 %vm1524_vm0, %v3112_v36 }
 0x23c   : > { %v3186_v31 = vadd.f32 %v2224_v26, %v2981_v59  ;;  %v1338_v45 = vpop.f32.mrb[35].mxu1  ;;  %v1445_v56 = vpop.f32.mrb[39].mxu0  ;;  %2329 = vmatpush3.bf16.msra.mxu1 %v2328_v16  ;;  %2244 = vmatprep.mubr.msk.f32.mxu1 %vm2514_vm1, %v3578_v50  ;;  %v3580_v26 = vmax.f32 %v3159_v35, 0.0  ;;  %v3581_v16 = vmax.f32 %v3162_v48, 0.0 }
 0x23d   : > { %v2315_v22 = vpack.c.bf16 %v3535_v51, %v3536_v14  ;;  %v2331_v29 = vpack.c.bf16 %v3538_v13, %v3539_v24  ;;  %v3198_v30 = vadd.f32 %v1445_v56, %v2979_v58  ;;  %2330 = vmatprep.subr.bf16.mxu1 %v2513_v53  ;;  %v3206_v57 = vadd.f32 %v1338_v45, %v2979_v58 }
 0x23e   : > { %3577 = vst [vmem:[#allocation14_spill] sm:$0xff] %v3186_v31  ;;  %v2317_v18 = vpack.c.bf16 %v3581_v16, %v3580_v26  ;;  %v3541_v50 = vmax.f32 %v3186_v31, 0.0  ;;  %v3210_v13 = vadd.f32 %v1336_v3, %v2979_v58 }
 0x23f   : > { %3579 = vst [vmem:[#allocation15_spill] sm:$0xff] %v3198_v30  ;;  %3582 = vst [vmem:[#allocation16_spill] sm:$0xff] %v3206_v57  ;;  %v3542_v51 = vmax.f32 %v3198_v30, 0.0  ;;  %v1342_v14 = vpop.f32.mrb[36].mxu1  ;;  %v2227_v19 = vpop.f32.mrb[40].mxu0  ;;  %2316 = vmatprep.subr.bf16.mxu0 %v2315_v22 }
 0x240   : > { %v3213_v56 = vadd.f32 %v1342_v14, %v2981_v59  ;;  %v3216_v24 = vadd.f32 %v2227_v19, %v3033_v55  ;;  %v1344_v26 = vpop.f32.mrb[37].mxu1  ;;  %v1455_v16 = vpop.f32.mrb[41].mxu0  ;;  %2318 = vmatpush1.bf16.msra.mxu0 %v2317_v18  ;;  %2332 = vmatpush3.bf16.msra.mxu1 %v2331_v29  ;;  %v3546_v14 = vmax.f32 %v3206_v57, 0.0 }
 0x241   : > { %v2334_v45 = vpack.c.bf16 %v3541_v50, %v3542_v51  ;;  %v3223_v22 = vadd.f32 %v1344_v26, %v2981_v59  ;;  %v3226_v3 = vadd.f32 %v1455_v16, %v3031_v28  ;;  %2333 = vmatprep.subr.bf16.mxu1 %v2513_v53  ;;  %v3550_v50 = vmax.f32 %v3210_v13, 0.0 }
 0x242   : > { %3583 = vst [vmem:[#allocation17_spill] sm:$0xff] %v3213_v56  ;;  %3584 = vst [vmem:[#allocation18_spill] sm:$0xff] %v3216_v24  ;;  %v3549_v58 = vmax.f32 %v3213_v56, 0.0  ;;  %v3547_v19 = vmax.f32 %v3216_v24, 0.0 }
 0x243   : > { %3585 = vst [vmem:[#allocation19_spill] sm:$0xff] %v3223_v22  ;;  %3586 = vst [vmem:[#allocation20_spill] sm:$0xff] %v3226_v3  ;;  %v3545_v18 = vmax.f32 %v3223_v22, 0.0  ;;  %v3548_v29 = vmax.f32 %v3226_v3, 0.0  ;;  %v1348_v30 = vpop.f32.mrb[38].mxu1 }
 0x244   : > { %v1350_v51 = vpop.f32.mrb[39].mxu1  ;;  %2335 = vmatpush3.bf16.msra.mxu1 %v2334_v45  ;;  %v2321_v16 = vpack.c.bf16 %v3549_v58, %v3550_v50  ;;  %v3250_v12 = vadd.f32 %v1348_v30, %v3031_v28 }
 0x245   : > { %v2319_v59 = vpack.c.bf16 %v3545_v18, %v3546_v14  ;;  %v2337_v26 = vpack.c.bf16 %v3547_v19, %v3548_v29  ;;  %2336 = vmatprep.subr.bf16.mxu1 %v2513_v53  ;;  %v3247_v31 = vadd.f32 %v1350_v51, %v3031_v28 }
 0x246   : > { %3588 = vst [vmem:[#allocation22_spill] sm:$0xff] %v3250_v12  ;;  %v3558_v28 = vmax.f32 %v3250_v12, 0.0 }
 0x247   : > { %3587 = vst [vmem:[#allocation21_spill] sm:$0xff] %v3247_v31  ;;  %v1354_v45 = vpop.f32.mrb[40].mxu1  ;;  %2320 = vmatprep.subr.bf16.mxu0 %v2319_v59  ;;  %v3553_v29 = vmax.f32 %v3247_v31, 0.0 }
 0x248   : > { %v3253_v18 = vadd.f32 %v1354_v45, %v3033_v55  ;;  %v1356_v14 = vpop.f32.mrb[41].mxu1  ;;  %2322 = vmatpush1.bf16.msra.mxu0 %v2321_v16  ;;  %2338 = vmatpush3.bf16.msra.mxu1 %v2337_v26 }
 0x249   : > { %v3256_v53 = vadd.f32 %v1356_v14, %v3033_v55  ;;  %v1523_v14 = vstv %s2343_s13 }
 0x24a   : > { %3589 = vst [vmem:[#allocation23_spill] sm:$0xff] %v3253_v18  ;;  %v3557_v19 = vmax.f32 %v3253_v18, 0.0 }
 0x24b   : > { %3590 = vst [vmem:[#allocation24_spill] sm:$0xff] %v3256_v53  ;;  %v3552_v51 = vmax.f32 %v3256_v53, 0.0  ;;  %2245 = vmatmul.mubr.msk.f32.vlgmr.msra.gmra.mrb[44].mxu1 %vm1524_vm0, %v3112_v36 }
 0x24c   : > { %v2325_v55 = vpack.c.bf16 %v3557_v19, %v3558_v28 }
 0x24d   : > { %v2323_v30 = vpack.c.bf16 %v3552_v51, %v3553_v29 }
 0x24f   : > { %2324 = vmatprep.subr.bf16.mxu0 %v2323_v30 }
 0x250   : > { %2326 = vmatpush1.bf16.msra.mxu0 %v2325_v55 }
 0x253   : > { %2166 = vmatmul.mubr.msk.f32.vlgmr.msra.gmra.mrb[44].mxu0 %vm1524_vm0, %v3112_v36 }
 0x306   : > { %v1594_v59 = vpop.f32.mrb[42].mxu0 }
 0x307   : > { %v1595_v26 = vadd.f32 %v1594_v59, %v1523_v14  ;;  %v1596_v16 = vpop.f32.mrb[43].mxu0 }
 0x308   : > { %v1597_v45 = vadd.f32 %v1596_v16, %v1523_v14 }
 0x30a   : > { %v1811_v58 = vmax.f32 %v1595_v26, %v1597_v45 }
 0x30e   : > { %v1665_v50 = vpop.f32.mrb[42].mxu1 }
 0x30f   : > { %v1666_v24 = vadd.f32 %v1665_v50, %v1523_v14  ;;  %v1667_v51 = vpop.f32.mrb[43].mxu1 }
 0x310   : > { %v1668_v29 = vadd.f32 %v1667_v51, %v1523_v14 }
 0x311   : > { %v1812_v3 = vmax.f32 %v1811_v58, %v1666_v24 }
 0x313   : > { %v1813_v53 = vmax.f32 %v1812_v3, %v1668_v29 }
 0x31e   : > { %v1807_v31 = vpop.f32.mrb[44].mxu1 }
 0x31f   : > { %v2246_v19 = vpop.f32.mrb[45].mxu1  ;;  %v1808_v46 = vadd.f32 %v1807_v31, %v1523_v14 }
 0x326   : > { %v1736_v30 = vpop.f32.mrb[44].mxu0 }
 0x327   : > { %v1737_v55 = vadd.f32 %v1736_v30, %v1523_v14  ;;  %v1738_v28 = vpop.f32.mrb[45].mxu0 }
 0x328   : > { %v1739_v22 = vadd.f32 %v1738_v28, %v1523_v14 }
 0x329   : > { %v1814_v36 = vmax.f32 %v1813_v53, %v1737_v55 }
 0x32b   : > { %v1815_v57 = vmax.f32 %v1814_v36, %v1739_v22 }
 0x32d   : > { %v1816_v54 = vmax.f32 %v1815_v57, %v1808_v46 }
 0x32f   : > { %v1817_v59 = vsub.f32 %v1595_v26, %v1816_v54  ;;  %v1820_v52 = vsub.f32 %v1597_v45, %v1816_v54  ;;  %v1823_v16 = vsub.f32 %v1666_v24, %v1816_v54  ;;  %v1826_v18 = vsub.f32 %v1668_v29, %v1816_v54 }
 0x330   : > { %v1829_v12 = vsub.f32 %v1737_v55, %v1816_v54  ;;  %v1832_v50 = vsub.f32 %v1739_v22, %v1816_v54  ;;  %v1835_v56 = vsub.f32 %v1808_v46, %v1816_v54 }
 0x331   : > { %v1818_v51 = vmul.f32 1.442695, %v1817_v59  ;;  %v1821_v58 = vmul.f32 1.442695, %v1820_v52  ;;  %v1824_v3 = vmul.f32 1.442695, %v1823_v16 }
 0x332   : > { %v1827_v19 = vmul.f32 1.442695, %v1826_v18  ;;  %v1830_v30 = vmul.f32 1.442695, %v1829_v12  ;;  %v1833_v53 = vmul.f32 1.442695, %v1832_v50 }
 0x333   : > { %2415 = vpow2.f32 %v1818_v51  ;;  %v1836_v31 = vmul.f32 1.442695, %v1835_v56 }
 0x334   : > { %2417 = vpow2.f32 %v1821_v58 }
 0x335   : > { %2419 = vpow2.f32 %v1824_v3 }
 0x336   : > { %2421 = vpow2.f32 %v1827_v19 }
 0x337   : > { %2423 = vpow2.f32 %v1830_v30 }
 0x338   : > { %2425 = vpow2.f32 %v1833_v53 }
 0x339   : > { %2427 = vpow2.f32 %v1836_v31 }
 0x33d   : > { %v2416_v57 = vpop.eup %2415 }
 0x33e   : > { %v2418_v28 = vpop.eup %2417 }
 0x33f   : > { %v1838_v24 = vadd.f32 %v2418_v28, %v2416_v57  ;;  %v2420_v29 = vpop.eup %2419 }
 0x340   : > { %v2422_v54 = vpop.eup %2421 }
 0x341   : > { %v1839_v22 = vadd.f32 %v2420_v29, %v1838_v24  ;;  %v2424_v52 = vpop.eup %2423 }
 0x342   : > { %v2426_v26 = vpop.eup %2425 }
 0x343   : > { %v1840_v46 = vadd.f32 %v2422_v54, %v1839_v22  ;;  %v2428_v18 = vpop.eup %2427  ;;  %v3592_v22 = vmax.f32 %v2918_v11, 0.0  ;;  %v3599_v11 = vmax.f32 %v2912_v15, 0.0  ;;  %v3606_v15 = vmax.f32 %v3062_v41, 0.0 }
 0x344   : > { %v3610_v41 = vmax.f32 %v3007_v4, 0.0 }
 0x345   : > { %v1841_v14 = vadd.f32 %v2424_v52, %v1840_v46  ;;  %v3593_v46 = vmax.f32 %v2946_v37, 0.0  ;;  %v3600_v37 = vmax.f32 %v2921_v17, 0.0 }
 0x347   : > { %v1842_v45 = vadd.f32 %v2426_v26, %v1841_v14  ;;  %v3594_v14 = vmax.f32 %v2952_v39, 0.0  ;;  %v3601_v39 = vmax.f32 %v2940_v33, 0.0 }
 0x349   : > { %v1843_v55 = vadd.f32 %v2428_v18, %v1842_v45  ;;  %v3595_v45 = vmax.f32 %v2992_v61, 0.0  ;;  %v3602_v61 = vmax.f32 %v2958_v43, 0.0 }
 0x34b   : > { %2429 = vrcp.f32 %v1843_v55  ;;  %v3596_v55 = vmax.f32 %v3004_v2, 0.0  ;;  %v3603_v2 = vmax.f32 %v2995_v62, 0.0  ;;  %v3607_v62 = vmax.f32 %v2949_v38, 0.0 }
 0x34c   : > { %v3614_v38 = vmax.f32 %v3104_v20, 0.0  ;;  %v3618_v20 = vmax.f32 %v3013_v9, 0.0 }
 0x355   : > { %v2430_v12 = vpop.eup %2429 }
 0x356   : > { %v1845_v36 = vmul.f32 %v2430_v12, %v2416_v57  ;;  %v1858_v59 = vmul.f32 %v2430_v12, %v2418_v28  ;;  %v1879_v56 = vmul.f32 %v2430_v12, %v2420_v29  ;;  %v1900_v16 = vmul.f32 %v2430_v12, %v2422_v54 }
 0x357   : > { %v1921_v50 = vmul.f32 %v2430_v12, %v2424_v52  ;;  %v1942_v51 = vmul.f32 %v2430_v12, %v2426_v26  ;;  %v1963_v58 = vmul.f32 %v2430_v12, %v2428_v18  ;;  %v3591_v28 = vmax.f32 %v2915_v10, 0.0 }
 0x358   : > { %v1849_v3 = vrot.slane %v1845_v36, %v2626_v7  ;;  %v1862_v19 = vrot.slane %v1858_v59, %v2626_v7  ;;  %v1883_v30 = vrot.slane %v1879_v56, %v2626_v7  ;;  %v1904_v53 = vrot.slane %v1900_v16, %v2626_v7 }
 0x359   : > { %v3279_v31 = vrot.slane %v1921_v50, %v2626_v7  ;;  %v3282_v24 = vrot.slane %v1942_v51, %v2626_v7  ;;  %v3285_v57 = vrot.slane %v1963_v58, %v2626_v7  ;;  %v3597_v7 = vmax.f32 %v3044_v60, 0.0 }
 0x35a   : > { %v1850_v29 = vmul.f32 %v1849_v3, %v3591_v28  ;;  %v1851_v54 = vmul.f32 %v1849_v3, %v3592_v22  ;;  %v1852_v52 = vmul.f32 %v1849_v3, %v3593_v46  ;;  %v1853_v26 = vmul.f32 %v1849_v3, %v3594_v14 }
 0x35b   : > { %v1854_v18 = vmul.f32 %v1849_v3, %v3595_v45  ;;  %v1855_v12 = vmul.f32 %v1849_v3, %v3596_v55  ;;  %v1856_v36 = vmul.f32 %v1849_v3, %v3597_v7  ;;  %v3598_v10 = vmax.f32 %v3056_v27, 0.0 }
 0x35c   : > { %v1863_v56 = vmul.f32 %v1862_v19, %v3599_v11  ;;  %v1864_v16 = vmul.f32 %v1862_v19, %v3600_v37  ;;  %v1865_v50 = vmul.f32 %v1862_v19, %v3601_v39  ;;  %v1866_v51 = vmul.f32 %v1862_v19, %v3602_v61 }
 0x35d   : > { %v1857_v59 = vmul.f32 %v1849_v3, %v3598_v10  ;;  %v1867_v58 = vmul.f32 %v1862_v19, %v3603_v2  ;;  %v3604_v60 = vmax.f32 %v3010_v8, 0.0  ;;  %v3605_v27 = vmax.f32 %v3047_v25, 0.0 }
 0x35e   : > { %v1870_v22 = vmul.f32 %v1862_v19, %v3606_v15  ;;  %v1871_v17 = vadd.f32 %v1863_v56, %v1850_v29  ;;  %v1872_v46 = vadd.f32 %v1864_v16, %v1851_v54  ;;  %v1873_v14 = vadd.f32 %v1865_v50, %v1852_v52 }
 0x35f   : > { %v1868_v28 = vmul.f32 %v1862_v19, %v3604_v60  ;;  %v1869_v3 = vmul.f32 %v1862_v19, %v3605_v27  ;;  %v1874_v33 = vadd.f32 %v1866_v51, %v1853_v26  ;;  %v1875_v45 = vadd.f32 %v1867_v58, %v1854_v18 }
 0x360   : > { %v1878_v7 = vadd.f32 %v1870_v22, %v1857_v59  ;;  %v1884_v10 = vmul.f32 %v1883_v30, %v3607_v62  ;;  %v3608_v8 = vmax.f32 %v2955_v40, 0.0  ;;  %v3609_v25 = vmax.f32 %v3001_v1, 0.0 }
 0x361   : > { %v1876_v55 = vadd.f32 %v1868_v28, %v1855_v12  ;;  %v1877_v43 = vadd.f32 %v1869_v3, %v1856_v36  ;;  %v1887_v19 = vmul.f32 %v1883_v30, %v3610_v41  ;;  %v3611_v29 = vmax.f32 %v3053_v6, 0.0 }
 0x362   : > { %v1885_v11 = vmul.f32 %v1883_v30, %v3608_v8  ;;  %v1886_v37 = vmul.f32 %v1883_v30, %v3609_v25  ;;  %v3612_v52 = vmax.f32 %v3059_v23, 0.0  ;;  %v3613_v18 = vmax.f32 %v3092_v49, 0.0 }
 0x363   : > { %v1888_v54 = vmul.f32 %v1883_v30, %v3611_v29  ;;  %v1891_v36 = vmul.f32 %v1883_v30, %v3614_v38  ;;  %v1892_v40 = vadd.f32 %v1884_v10, %v1871_v17  ;;  %v1895_v56 = vadd.f32 %v1887_v19, %v1874_v33  ;;  %v3628_v10 = vld [vmem:[#allocation17_spill] sm:$0xff]  ;;  %v3634_v38 = vld [vmem:[#allocation6_spill] sm:$0xff] }
 0x364   : > { %v1889_v26 = vmul.f32 %v1883_v30, %v3612_v52  ;;  %v1890_v12 = vmul.f32 %v1883_v30, %v3613_v18  ;;  %v1893_v59 = vadd.f32 %v1885_v11, %v1872_v46  ;;  %v1894_v1 = vadd.f32 %v1886_v37, %v1873_v14  ;;  %v3630_v11 = vld [vmem:[#allocation22_spill] sm:$0xff]  ;;  %v3632_v37 = vld [vmem:[#allocation23_spill] sm:$0xff] }
 0x365   : > { %v1896_v16 = vadd.f32 %v1888_v54, %v1875_v45  ;;  %v1899_v50 = vadd.f32 %v1891_v36, %v1878_v7  ;;  %v3615_v6 = vmax.f32 %v2943_v34, 0.0  ;;  %v3616_v23 = vmax.f32 %v2961_v44, 0.0 }
 0x366   : > { %v1897_v4 = vadd.f32 %v1889_v26, %v1876_v55  ;;  %v1898_v39 = vadd.f32 %v1890_v12, %v1877_v43  ;;  %v3617_v49 = vmax.f32 %v2998_v63, 0.0  ;;  %v1908_v30 = vmul.f32 %v1904_v53, %v3618_v20 }
 0x367   : > { %v1905_v61 = vmul.f32 %v1904_v53, %v3615_v6  ;;  %v1906_v51 = vmul.f32 %v1904_v53, %v3616_v23  ;;  %v3619_v58 = vmax.f32 %v3050_v0, 0.0  ;;  %v3620_v28 = vmax.f32 %v3065_v42, 0.0 }
 0x368   : > { %v1907_v2 = vmul.f32 %v1904_v53, %v3617_v49  ;;  %v3621_v3 = vmax.f32 %v3095_v5, 0.0  ;;  %v3622_v15 = vmax.f32 %v3115_v21, 0.0  ;;  %v1916_v46 = vadd.f32 %v1908_v30, %v1895_v56  ;;  %v3644_v49 = vld [vmem:[#allocation19_spill] sm:$0xff]  ;;  %v3646_v30 = vld [vmem:[#allocation21_spill] sm:$0xff] }
 0x369   : > { %v1909_v60 = vmul.f32 %v1904_v53, %v3619_v58  ;;  %v1910_v27 = vmul.f32 %v1904_v53, %v3620_v28  ;;  %v1913_v22 = vadd.f32 %v1905_v61, %v1892_v40  ;;  %v1914_v63 = vadd.f32 %v1906_v51, %v1893_v59  ;;  %v3636_v59 = vld [vmem:[#allocation7_spill] sm:$0xff]  ;;  %v3642_v61 = vld [vmem:[#allocation16_spill] sm:$0xff] }
 0x36a   : > { %v1911_v34 = vmul.f32 %v1904_v53, %v3621_v3  ;;  %v1912_v44 = vmul.f32 %v1904_v53, %v3622_v15  ;;  %v1915_v17 = vadd.f32 %v1907_v2, %v1894_v1  ;;  %v3623_v45 = vmax.f32 %v3101_v47, 0.0  ;;  %v3648_v28 = vld [vmem:[#allocation24_spill] sm:$0xff] }
 0x36b   : > { %v1917_v9 = vadd.f32 %v1909_v60, %v1896_v16  ;;  %v1918_v14 = vadd.f32 %v1910_v27, %v1897_v4  ;;  %v3624_v5 = vmax.f32 %v3107_v32, 0.0  ;;  %v3625_v21 = vmax.f32 %v3159_v35, 0.0  ;;  %v3638_v16 = vld [vmem:[#allocation10_spill] sm:$0xff] }
 0x36c   : > { %v1919_v33 = vadd.f32 %v1911_v34, %v1898_v39  ;;  %v1920_v0 = vadd.f32 %v1912_v44, %v1899_v50  ;;  %v1926_v42 = vmul.f32 %v3279_v31, %v3623_v45  ;;  %v3626_v43 = vmax.f32 %v3162_v48, 0.0  ;;  %v3640_v39 = vld [vmem:[#allocation12_spill] sm:$0xff] }
 0x36d   : > { %v1927_v55 = vmul.f32 %v3279_v31, %v3624_v5  ;;  %v1928_v53 = vmul.f32 %v3279_v31, %v3625_v21  ;;  %v3627_v62 = vmax.f32 %v3210_v13, 0.0  ;;  %v3629_v8 = vmax.f32 %v3628_v10, 0.0  ;;  %v3652_v45 = vld [vmem:[#allocation8_spill] sm:$0xff] }
 0x36e   : > { %v1929_v7 = vmul.f32 %v3279_v31, %v3626_v43  ;;  %v3631_v25 = vmax.f32 %v3630_v11, 0.0  ;;  %v3633_v41 = vmax.f32 %v3632_v37, 0.0  ;;  %v1934_v19 = vadd.f32 %v1926_v42, %v1913_v22 }
 0x36f   : > { %v1930_v47 = vmul.f32 %v3279_v31, %v3627_v62  ;;  %v1931_v32 = vmul.f32 %v3279_v31, %v3629_v8  ;;  %v1935_v29 = vadd.f32 %v1927_v55, %v1914_v63  ;;  %v1936_v54 = vadd.f32 %v1928_v53, %v1915_v17  ;;  %v3656_v53 = vld [vmem:[#allocation11_spill] sm:$0xff]  ;;  %v3660_v8 = vld [vmem:[#allocation14_spill] sm:$0xff] }
 0x370   : > { %v1932_v35 = vmul.f32 %v3279_v31, %v3631_v25  ;;  %v1933_v48 = vmul.f32 %v3279_v31, %v3633_v41  ;;  %v1937_v52 = vadd.f32 %v1929_v7, %v1916_v46  ;;  %v3635_v36 = vmax.f32 %v3634_v38, 0.0  ;;  %v3658_v62 = vld [vmem:[#allocation15_spill] sm:$0xff]  ;;  %v3662_v25 = vld [vmem:[#allocation20_spill] sm:$0xff]  ;;  %v3664_v41 = vld [vmem:[#allocation18_spill] sm:$0xff] }
 0x371   : > { %v1938_v26 = vadd.f32 %v1930_v47, %v1917_v9  ;;  %v1939_v13 = vadd.f32 %v1931_v32, %v1918_v14  ;;  %v3637_v1 = vmax.f32 %v3636_v59, 0.0  ;;  %v3639_v4 = vmax.f32 %v3638_v16, 0.0  ;;  %v3650_v14 = vld [vmem:[#allocation9_spill] sm:$0xff] }
 0x372   : > { %v1940_v18 = vadd.f32 %v1932_v35, %v1919_v33  ;;  %v1941_v12 = vadd.f32 %v1933_v48, %v1920_v0  ;;  %v1947_v40 = vmul.f32 %v3282_v24, %v3635_v36  ;;  %v3641_v50 = vmax.f32 %v3640_v39, 0.0 }
 0x373   : > { %v1948_v56 = vmul.f32 %v3282_v24, %v3637_v1  ;;  %v1949_v31 = vmul.f32 %v3282_v24, %v3639_v4  ;;  %v3643_v23 = vmax.f32 %v3642_v61, 0.0  ;;  %v3645_v2 = vmax.f32 %v3644_v49, 0.0 }
 0x374   : > { %v1950_v6 = vmul.f32 %v3282_v24, %v3641_v50  ;;  %v3647_v58 = vmax.f32 %v3646_v30, 0.0  ;;  %v3649_v27 = vmax.f32 %v3648_v28, 0.0  ;;  %v1955_v34 = vadd.f32 %v1947_v40, %v1934_v19 }
 0x375   : > { %v1951_v51 = vmul.f32 %v3282_v24, %v3643_v23  ;;  %v1952_v20 = vmul.f32 %v3282_v24, %v3645_v2  ;;  %v1956_v15 = vadd.f32 %v1948_v56, %v1935_v29  ;;  %v1957_v44 = vadd.f32 %v1949_v31, %v1936_v54 }
 0x376   : > { %v1953_v60 = vmul.f32 %v3282_v24, %v3647_v58  ;;  %v1954_v3 = vmul.f32 %v3282_v24, %v3649_v27  ;;  %v1958_v22 = vadd.f32 %v1950_v6, %v1937_v52  ;;  %v3651_v33 = vmax.f32 %v3650_v14, 0.0  ;;  %v3654_v24 = vld [vmem:[#allocation13_spill] sm:$0xff] }
 0x377   : > { %v1959_v63 = vadd.f32 %v1951_v51, %v1938_v26  ;;  %v1960_v17 = vadd.f32 %v1952_v20, %v1939_v13  ;;  %v3653_v42 = vmax.f32 %v3652_v45, 0.0  ;;  %v3655_v55 = vmax.f32 %v3654_v24, 0.0 }
 0x378   : > { %v1961_v46 = vadd.f32 %v1953_v60, %v1940_v18  ;;  %v1962_v9 = vadd.f32 %v1954_v3, %v1941_v12  ;;  %v1968_v0 = vmul.f32 %v3285_v57, %v3651_v33  ;;  %v3657_v43 = vmax.f32 %v3656_v53, 0.0 }
 0x379   : > { %v1969_v5 = vmul.f32 %v3285_v57, %v3653_v42  ;;  %v1970_v21 = vmul.f32 %v3285_v57, %v3655_v55  ;;  %v3659_v47 = vmax.f32 %v3658_v62, 0.0  ;;  %v3661_v32 = vmax.f32 %v3660_v8, 0.0 }
 0x37a   : > { %v1971_v7 = vmul.f32 %v3285_v57, %v3657_v43  ;;  %v3663_v35 = vmax.f32 %v3662_v25, 0.0  ;;  %v3665_v48 = vmax.f32 %v3664_v41, 0.0  ;;  %v1976_v29 = vadd.f32 %v1968_v0, %v1955_v34 }
 0x37b   : > { %v1972_v10 = vmul.f32 %v3285_v57, %v3659_v47  ;;  %v1973_v11 = vmul.f32 %v3285_v57, %v3661_v32  ;;  %v1977_v54 = vadd.f32 %v1969_v5, %v1956_v15  ;;  %v1978_v52 = vadd.f32 %v1970_v21, %v1957_v44 }
 0x37c   : > { %v1974_v37 = vmul.f32 %v3285_v57, %v3663_v35  ;;  %v1975_v19 = vmul.f32 %v3285_v57, %v3665_v48  ;;  %v1979_v26 = vadd.f32 %v1971_v7, %v1958_v22  ;;  %1984 = vst [vmem:[%s295_s19] sm:$0xff] %v1976_v29 }
 0x37d   : > { %v1980_v13 = vadd.f32 %v1972_v10, %v1959_v63  ;;  %v1981_v18 = vadd.f32 %v1973_v11, %v1960_v17  ;;  %1985 = vst [vmem:[%s295_s19 + $0x8] sm:$0xff] %v1977_v54  ;;  %1986 = vst [vmem:[%s295_s19 + $0x10] sm:$0xff] %v1978_v52 }
 0x37e   : > { %v1982_v12 = vadd.f32 %v1974_v37, %v1961_v46  ;;  %v1983_v38 = vadd.f32 %v1975_v19, %v1962_v9  ;;  %1987 = vst [vmem:[%s295_s19 + $0x18] sm:$0xff] %v1979_v26 }
 0x37f   : > { %1988 = vst [vmem:[%s295_s19 + $0x20] sm:$0xff] %v1980_v13  ;;  %1989 = vst [vmem:[%s295_s19 + $0x28] sm:$0xff] %v1981_v18 }
 0x380   : > { %1990 = vst [vmem:[%s295_s19 + $0x30] sm:$0xff] %v1982_v12  ;;  %1991 = vst [vmem:[%s295_s19 + $0x38] sm:$0xff] %v1983_v38 }
 0x381   : > { %2444 = shalt.err (!%p2441_p5)
}
 0x382   : > { %s2445_s11 = scalar_lea.hbm %s3433_s22, 1024  ;;  %s2449_s17 = scalar_lea.hbm %s3492_s7, 2048 }
 0x383   : > { %p2446_p6 = scmp.ne.s32.totalorder %s3433_s22, %s2445_s11  ;;  %p2450_p10 = scmp.lt.u32.totalorder %s3433_s22, %s3492_s7 }
 0x384   : > { %p2451_p11 = scmp.lt.u32.totalorder %s2449_s17, %s2445_s11  ;;  %p2453_p13 = scmp.lt.u32.totalorder %s2445_s11, %s3433_s22 }
 0x385   : > { %p2447_p7 = pnand %p2446_p6, %p2601_p4 }
 0x386   : > { %p2452_p12 = por %p2451_p11, %p2450_p10 }
 0x387   : > { %p2448_p9 = pneg %p2447_p7 }
 0x388   : > { %p2454_p0 = por %p2453_p13, %p2452_p12 }
 0x38a   : > { %p2455_p1 = pnand %p2454_p0, %p2448_p9 }
 0x38c   : > { %2458 = shalt.err (!%p2455_p1)
}
 0x38d   : > { %s2516_s29 = smov 128   ;;  %s2517_s21 = smov 8  }
 0x38e   : > { %2344 = dma.vmem_to_hbm [thread:$0]  (%p2601_p4), %s3435_s20, 1024, %s3433_s22, %s3439_s23, %s2516_s29, %s2516_s29, %s2517_s21  }
 0x38f PF: > { %p2350_p2 = scmp.ge.s32.totalorder %s2509_s8, 2  ;;  %s2022_s24 = sand.u32 1, %s2489_s26  }
 0x390   : > { %s2023_s25 = scalar_lea.sflag [#allocation4], %s2022_s24 }
 0x391   : > { %p2347_p3 = pnand %p2350_p2, %p2608_p8 }
 0x393   : > { %2484 = dma.done.wait (!%p2347_p3), %s2023_s25, 1024  }
 0x394   : > { %2486 = vsyncadd (!%p2347_p3), %s2023_s25, 4294966272  ;;  %s22_s8 = sadd.s32 1, %s2509_s8   ;;  %s3666_s26 = smov %s2493_s27 }
 0x395   : > { %p19_p5 = scmp.ge.s32.totalorder %s22_s8, 4   ;;  %s3667_s27 = smov %s2497_s28 }
 0x396   : > { %s3668_s28 = smov %s2614_s15  ;;  %s3669_s29 = smov %s2505_s30 }
 0x397   : > { %s3670_s30 = smov %s3672_s10  ;;  %21 = sbr.rel (!%p19_p5) target bundleno = 7 (0x7), region = 85 }
 0x39e   :  { %2028 = vsyncpa [#allocation4], 1 }
 0x39f   :  { %2030 = vsyncpa [#allocation4 + $0x1], 1 }

</bundles_post_ra>
